<compile_context>
chip_gen: v6e
topology: v6e:2x2x1
jax: 0.10.0
libtpu: 0.0.40
codegen_flags: <defaults>
</compile_context>

<pallas_src>
import jax
import jax.numpy as jnp
from jax.experimental import pallas as pl
from jax.experimental.pallas import tpu as pltpu

BN_EPS = 1e-5


def _round_up(v, m):
    return ((v + m - 1) // m) * m


def _make_fused_gnn_kernel(stack_outputs: bool, n_real: int, n_pad: int):
    """Build the per-layer grid-step kernel body.

    stack_outputs: True  -> out block is [1, Np, D] (per-layer slab, JK concat/max/sum)
                   False -> out block is [Np, D] resident (JK == 'last', single HBM writeback)
    """
    inv_n = 1.0 / float(n_real)          # real node count (padding-aware BN statistics)
    padded = n_pad != n_real

    def kernel(eps_ref,                      # SMEM [L]      GIN epsilon per layer
               h0_ref,                       # VMEM [Np, D]  f32 (resident, single buffered)
               gmat_ref, dmat_t_ref,         # VMEM [Ep, Np] / [Np, Ep] bf16 one-hot (resident)
               eemb_ref,                     # VMEM [1, Ep, D] bf16 (streamed per layer)
               gamma_ref, beta_ref,          # VMEM [1, 1, D] f32
               w1_ref, b1_ref, w2_ref, b2_ref,   # per-layer MLP params (w bf16, b f32)
               out_ref,                      # OUT
               carry_ref):                   # VMEM scratch [Np, D] f32 (layer carry)
        l = pl.program_id(0)
        last = pl.num_programs(0) - 1

        # ---- init the layer carry from the kernel input on the first grid step ----
        @pl.when(l == 0)
        def _():
            carry_ref[...] = h0_ref[...]

        h = carry_ref[...]                                       # [Np, D] f32; padded rows are 0

        # ---- BatchNorm1d (training-mode batch stats, biased variance) ----
        # One-pass stats (sum + sum-of-squares), gamma folded into a single per-channel scale.
        mean = jnp.sum(h, axis=0, keepdims=True) * inv_n         # [1, D]
        ex2 = jnp.sum(h * h, axis=0, keepdims=True) * inv_n
        var = jnp.maximum(ex2 - mean * mean, 0.0)
        scale = gamma_ref[0] * jax.lax.rsqrt(var + BN_EPS)       # [1, D]
        shift = beta_ref[0] - mean * scale
        h_bn = h * scale + shift                                 # [Np, D] f32

        # ---- GIN conv: gather, msg = relu(x_j + edge_emb), scatter-add (bf16 MXU, f32 acc) ----
        x_j = jnp.dot(gmat_ref[...], h_bn.astype(jnp.bfloat16),
                      preferred_element_type=jnp.float32)        # [Ep, D] f32
        msg = jnp.maximum(x_j + eemb_ref[0], 0.0)                # bf16 edge_emb promotes to f32
        aggr = jnp.dot(dmat_t_ref[...], msg.astype(jnp.bfloat16),
                       preferred_element_type=jnp.float32)       # [Np, D] f32

        pre = (1.0 + eps_ref[l]) * h_bn + aggr

        # ---- MLP: Linear(D, 2D) -> ReLU -> Linear(2D, D), bf16 operands on the MXU ----
        hid = jnp.maximum(
            jnp.dot(pre.astype(jnp.bfloat16), w1_ref[0],
                    preferred_element_type=jnp.float32) + b1_ref[0], 0.0)
        out = jnp.dot(hid.astype(jnp.bfloat16), w2_ref[0],
                      preferred_element_type=jnp.float32) + b2_ref[0]

        # ---- carry: ReLU for non-final layers (drop_ratio = 0 -> dropout is identity) ----
        carry_ref[...] = out

        @pl.when(l != last)
        def _():
            carry_ref[...] = jnp.maximum(out, 0.0)

        if padded:
            # Keep padded node rows at exactly 0 so next-layer BN sums stay exact.
            rows = jax.lax.broadcasted_iota(jnp.int32, (n_pad, 1), 0)
            carry_ref[...] = jnp.where(rows < n_real, carry_ref[...], 0.0)

        if stack_outputs:
            out_ref[0] = carry_ref[...]          # per-layer slab for JK concat/max/sum
        else:
            out_ref[...] = carry_ref[...]        # resident block; only final value hits HBM

    return kernel


def molecule_gnn_pallas(x_pad, gmat, dmat_t, edge_emb, params, *, n_real, stack_outputs):
    """Run all GNN layers in one gridded pallas_call."""
    Np, D = x_pad.shape
    Ep = gmat.shape[0]
    L = params["w1"].shape[0]

    resident = lambda l: (0, 0)          # constant block index -> stays in VMEM across layers
    per_layer = lambda l: (l, 0, 0)      # streamed per grid step

    # MLP weights in bf16 (MXU-native); biases/BN params stay f32.
    w1 = params["w1"].astype(jnp.bfloat16)
    w2 = params["w2"].astype(jnp.bfloat16)

    # ---- explicit VMEM budget: residents (single-buffered) + 2x streamed + output + scratch ----
    bytes_resident = Np * D * 4 + 2 * (Ep * Np * 2)
    per_layer_bytes = (Ep * D * 2          # edge_emb bf16
                       + 2 * D * 4         # gamma, beta
                       + D * 2 * D * 2     # w1 bf16
                       + 2 * D * 4         # b1
                       + 2 * D * D * 2     # w2 bf16
                       + D * 4)            # b2
    bytes_streamed = 2 * per_layer_bytes   # double-buffered streamed blocks
    bytes_out = 2 * Np * D * 4
    bytes_scratch = Np * D * 4
    vmem_limit = int(1.5 * (bytes_resident + bytes_streamed + bytes_out + bytes_scratch)) + (2 << 20)
    vmem_limit = min(max(vmem_limit, 32 * 1024 * 1024), 64 * 1024 * 1024)

    if stack_outputs:
        out_shape = jax.ShapeDtypeStruct((L, Np, D), jnp.float32)
        out_spec = pl.BlockSpec((1, Np, D), per_layer)
    else:
        out_shape = jax.ShapeDtypeStruct((Np, D), jnp.float32)
        out_spec = pl.BlockSpec((Np, D), resident)

    kernel = _make_fused_gnn_kernel(stack_outputs, n_real, Np)

    return pl.pallas_call(
        kernel,
        out_shape=out_shape,
        grid=(L,),
        in_specs=[
            pl.BlockSpec(memory_space=pltpu.MemorySpace.SMEM),                    # eps      [L]
            pl.BlockSpec((Np, D), resident, pipeline_mode=pl.Buffered(1)),        # h0       [Np, D]
            pl.BlockSpec((Ep, Np), resident, pipeline_mode=pl.Buffered(1)),       # gmat     [Ep, Np] bf16
            pl.BlockSpec((Np, Ep), resident, pipeline_mode=pl.Buffered(1)),       # dmat_t   [Np, Ep] bf16
            pl.BlockSpec((1, Ep, D), per_layer),                                  # edge_emb [L, Ep, D] bf16
            pl.BlockSpec((1, 1, D), per_layer),                                   # gamma    [L, 1, D]
            pl.BlockSpec((1, 1, D), per_layer),                                   # beta     [L, 1, D]
            pl.BlockSpec((1, D, 2 * D), per_layer),                               # w1       [L, D, 2D] bf16
            pl.BlockSpec((1, 1, 2 * D), per_layer),                               # b1       [L, 1, 2D]
            pl.BlockSpec((1, 2 * D, D), per_layer),                               # w2       [L, 2D, D] bf16
            pl.BlockSpec((1, 1, D), per_layer),                                   # b2       [L, 1, D]
        ],
        out_specs=out_spec,
        scratch_shapes=[pltpu.VMEM((Np, D), jnp.float32)],                        # layer carry
        compiler_params=pltpu.CompilerParams(
            dimension_semantics=("arbitrary",),                                   # sequential layer carry
            vmem_limit_bytes=vmem_limit),
    )(params["eps"], x_pad, gmat, dmat_t, edge_emb,
      params["gamma"], params["beta"], w1, params["b1"], w2, params["b2"])


def init_params(key, num_layers, emb_dim, edge_dim):
    def one_layer(k):
        k_e, k_1, k_2 = jax.random.split(k, 3)
        return dict(
            gamma=jnp.ones((1, emb_dim), jnp.float32),
            beta=jnp.zeros((1, emb_dim), jnp.float32),
            w_edge=0.1 * jax.random.normal(k_e, (edge_dim, emb_dim), jnp.float32),
            b_edge=jnp.zeros((1, emb_dim), jnp.float32),
            w1=(1.0 / jnp.sqrt(emb_dim)) *
               jax.random.normal(k_1, (emb_dim, 2 * emb_dim), jnp.float32),
            b1=jnp.zeros((1, 2 * emb_dim), jnp.float32),
            w2=(1.0 / jnp.sqrt(2 * emb_dim)) *
               jax.random.normal(k_2, (2 * emb_dim, emb_dim), jnp.float32),
            b2=jnp.zeros((1, emb_dim), jnp.float32),
            eps=jnp.zeros((), jnp.float32),                      # GIN eps (init 0)
        )
    layers = [one_layer(k) for k in jax.random.split(key, num_layers)]
    # Stack along a leading layer axis: gamma [L,1,D], w1 [L,D,2D], eps [L], ...
    return jax.tree_util.tree_map(lambda *xs: jnp.stack(xs, axis=0), *layers)


def molecule_gnn_forward(x, edge_index, edge_attr, params, JK="last"):
    N, D = x.shape
    E = edge_index.shape[1]
    L = params["w1"].shape[0]
    src, dst = edge_index[0], edge_index[1]

    # Pad node axis to the 128-lane width and edge axis to the 256-wide MXU tile.
    Np = max(_round_up(N, 128), 128)
    Ep = max(_round_up(E, 256), 256)

    x_pad = jnp.zeros((Np, D), jnp.float32).at[:N].set(x)

    # One-hot gather / scatter matrices in bf16 (0/1 exact in bf16; halves VMEM + DMA bytes).
    # Scatter matrix is pre-transposed to [Np, Ep] so the kernel uses a plain jnp.dot.
    gmat = jnp.zeros((Ep, Np), jnp.bfloat16).at[:E].set(
        jax.nn.one_hot(src, Np, dtype=jnp.bfloat16))             # [Ep, Np]
    dmat_t = jnp.zeros((Np, Ep), jnp.bfloat16).at[:, :E].set(
        jax.nn.one_hot(dst, Np, dtype=jnp.bfloat16).T)           # [Np, Ep]

    # Edge encoder hoisted out of the kernel; streamed per layer in bf16, zero-padded on E.
    edge_emb_f32 = (jnp.einsum("ef,lfd->led", edge_attr, params["w_edge"],
                               preferred_element_type=jnp.float32)
                    + params["b_edge"])                          # [L, E, D]
    edge_emb = jnp.zeros((L, Ep, D), jnp.bfloat16).at[:, :E, :].set(
        edge_emb_f32.astype(jnp.bfloat16))

    stack_outputs = JK != "last"
    out = molecule_gnn_pallas(x_pad, gmat, dmat_t, edge_emb, params,
                              n_real=N, stack_outputs=stack_outputs)

    if JK == "last":
        return out[:N]                                           # single [N, D] writeback

    hstack = out[:, :N, :]                                       # [L, N, D]
    h_list = [x] + [hstack[i] for i in range(L)]
    if JK == "concat":
        return jnp.concatenate(h_list, axis=1)
    elif JK == "max":
        return jnp.max(jnp.stack(h_list, axis=0), axis=0)
    elif JK == "sum":
        return jnp.sum(jnp.stack(h_list, axis=0), axis=0)
    raise ValueError(JK)


if __name__ == "__main__":
    num_layers = 3
    emb_dim = 128
    edge_dim = 8
    N, E = 32, 64

    key = jax.random.PRNGKey(0)
    k_x, k_ei, k_ea, k_p = jax.random.split(key, 4)

    x = jax.random.normal(k_x, (N, emb_dim), jnp.float32)
    edge_index = jax.random.randint(k_ei, (2, E), 0, N, dtype=jnp.int32)
    edge_attr = jax.random.normal(k_ea, (E, edge_dim), jnp.float32)

    params = init_params(k_p, num_layers, emb_dim, edge_dim)

    out = molecule_gnn_forward(x, edge_index, edge_attr, params, JK="last")
    jax.block_until_ready(out)
    assert out.shape == (N, emb_dim)
    print("KERNEL_OK")
</pallas_src>

<mosaic_0001>
module attributes {stable_mosaic.version = 11 : i64} {
  func.func @kernel(%arg0: i32, %arg1: memref<3xf32, #tpu.memory_space<smem>>, %arg2: memref<128x128xf32, #tpu.memory_space<vmem>>, %arg3: memref<256x128xbf16, #tpu.memory_space<vmem>>, %arg4: memref<128x256xbf16, #tpu.memory_space<vmem>>, %arg5: memref<1x256x128xbf16, #tpu.memory_space<vmem>>, %arg6: memref<1x1x128xf32, #tpu.memory_space<vmem>>, %arg7: memref<1x1x128xf32, #tpu.memory_space<vmem>>, %arg8: memref<1x128x256xbf16, #tpu.memory_space<vmem>>, %arg9: memref<1x1x256xf32, #tpu.memory_space<vmem>>, %arg10: memref<1x256x128xbf16, #tpu.memory_space<vmem>>, %arg11: memref<1x1x128xf32, #tpu.memory_space<vmem>>, %arg12: memref<128x128xf32, #tpu.memory_space<vmem>>, %arg13: memref<128x128xf32, #tpu.memory_space<vmem>>) attributes {dimension_semantics = [#tpu.dimension_semantics<arbitrary>], iteration_bounds = array<i64: 3>, scalar_prefetch = 0 : i64, scratch_operands = 1 : i64, tpu.core_type = #tpu.core_type<tc>, window_params = [{transform_indices = @transform_0, window_bounds = array<i64: 3>}, {pipeline_mode = #tpu.pipeline_mode<synchronous>, transform_indices = @transform_1, window_bounds = array<i64: 128, 128>}, {pipeline_mode = #tpu.pipeline_mode<synchronous>, transform_indices = @transform_2, window_bounds = array<i64: 256, 128>}, {pipeline_mode = #tpu.pipeline_mode<synchronous>, transform_indices = @transform_3, window_bounds = array<i64: 128, 256>}, {transform_indices = @transform_4, window_bounds = array<i64: 1, 256, 128>}, {transform_indices = @transform_5, window_bounds = array<i64: 1, 1, 128>}, {transform_indices = @transform_6, window_bounds = array<i64: 1, 1, 128>}, {transform_indices = @transform_7, window_bounds = array<i64: 1, 128, 256>}, {transform_indices = @transform_8, window_bounds = array<i64: 1, 1, 256>}, {transform_indices = @transform_9, window_bounds = array<i64: 1, 256, 128>}, {transform_indices = @transform_10, window_bounds = array<i64: 1, 1, 128>}, {pipeline_mode = #tpu.pipeline_mode<synchronous>, transform_indices = @transform_11, window_bounds = array<i64: 128, 128>}]} {
    %c0_i32 = arith.constant 0 : i32
    %0 = arith.cmpi eq, %arg0, %c0_i32 : i32
    %1 = arith.extui %0 : i1 to i32
    %c0_i32_0 = arith.constant 0 : i32
    %2 = arith.cmpi ne, %1, %c0_i32_0 : i32
    scf.if %2 {
      %c0_51 = arith.constant 0 : index
      %c0_52 = arith.constant 0 : index
      %82 = vector.load %arg2[%c0_51, %c0_52] : memref<128x128xf32, #tpu.memory_space<vmem>>, vector<128x128xf32>
      %c0_53 = arith.constant 0 : index
      %c0_54 = arith.constant 0 : index
      %83 = vector.load %arg13[%c0_53, %c0_54] : memref<128x128xf32, #tpu.memory_space<vmem>>, vector<128x128xf32>
      tpu.vector_store %arg13[%c0_53, %c0_54], %82 {strides = array<i32>} : memref<128x128xf32, #tpu.memory_space<vmem>>, vector<128x128xf32>,
    } else {
    }
    %c0 = arith.constant 0 : index
    %c0_1 = arith.constant 0 : index
    %3 = vector.load %arg13[%c0, %c0_1] : memref<128x128xf32, #tpu.memory_space<vmem>>, vector<128x128xf32>
    %cst = arith.constant dense<0.000000e+00> : vector<128xf32>
    %4 = vector.multi_reduction <add>, %3, %cst [0] : vector<128x128xf32> to vector<128xf32>
    %5 = vector.shape_cast %4 : vector<128xf32> to vector<1x128xf32>
    %cst_2 = arith.constant 3.125000e-02 : f32
    %6 = vector.broadcast %cst_2 : f32 to vector<1x128xf32>
    %7 = arith.mulf %5, %6 : vector<1x128xf32>
    %8 = arith.mulf %3, %3 : vector<128x128xf32>
    %cst_3 = arith.constant dense<0.000000e+00> : vector<128xf32>
    %9 = vector.multi_reduction <add>, %8, %cst_3 [0] : vector<128x128xf32> to vector<128xf32>
    %10 = vector.shape_cast %9 : vector<128xf32> to vector<1x128xf32>
    %cst_4 = arith.constant 3.125000e-02 : f32
    %11 = vector.broadcast %cst_4 : f32 to vector<1x128xf32>
    %12 = arith.mulf %10, %11 : vector<1x128xf32>
    %13 = arith.mulf %7, %7 : vector<1x128xf32>
    %14 = arith.subf %12, %13 : vector<1x128xf32>
    %cst_5 = arith.constant 0.000000e+00 : f32
    %15 = vector.broadcast %cst_5 : f32 to vector<1x128xf32>
    %16 = arith.maximumf %14, %15 : vector<1x128xf32>
    %c0_6 = arith.constant 0 : index
    %c0_7 = arith.constant 0 : index
    %c0_8 = arith.constant 0 : index
    %17 = vector.load %arg6[%c0_6, %c0_7, %c0_8] : memref<1x1x128xf32, #tpu.memory_space<vmem>>, vector<1x1x128xf32>
    %18 = vector.shape_cast %17 : vector<1x1x128xf32> to vector<1x128xf32>
    %cst_9 = arith.constant 9.99999974E-6 : f32
    %19 = vector.broadcast %cst_9 : f32 to vector<1x128xf32>
    %20 = arith.addf %16, %19 : vector<1x128xf32>
    %21 = math.rsqrt %20 : vector<1x128xf32>
    %22 = arith.mulf %18, %21 : vector<1x128xf32>
    %c0_10 = arith.constant 0 : index
    %c0_11 = arith.constant 0 : index
    %c0_12 = arith.constant 0 : index
    %23 = vector.load %arg7[%c0_10, %c0_11, %c0_12] : memref<1x1x128xf32, #tpu.memory_space<vmem>>, vector<1x1x128xf32>
    %24 = vector.shape_cast %23 : vector<1x1x128xf32> to vector<1x128xf32>
    %25 = arith.mulf %7, %22 : vector<1x128xf32>
    %26 = arith.subf %24, %25 : vector<1x128xf32>
    %27 = vector.broadcast %22 : vector<1x128xf32> to vector<128x128xf32>
    %28 = arith.mulf %3, %27 : vector<128x128xf32>
    %29 = vector.broadcast %26 : vector<1x128xf32> to vector<128x128xf32>
    %30 = arith.addf %28, %29 : vector<128x128xf32>
    %c0_13 = arith.constant 0 : index
    %c0_14 = arith.constant 0 : index
    %31 = vector.load %arg3[%c0_13, %c0_14] : memref<256x128xbf16, #tpu.memory_space<vmem>>, vector<256x128xbf16>
    %32 = arith.truncf %30 : vector<128x128xf32> to vector<128x128xbf16>
    %cst_15 = arith.constant dense<0.000000e+00> : vector<256x128xf32>
    %33 = tpu.matmul %31, %32, %cst_15 {dimension_numbers = #tpu.dot_dimension_numbers<[1], [0], [0], [1], [0, 0, 1, 1], [], []>} : vector<256x128xbf16>, vector<128x128xbf16>, vector<256x128xf32> -> vector<256x128xf32>
    %c0_16 = arith.constant 0 : index
    %c0_17 = arith.constant 0 : index
    %c0_18 = arith.constant 0 : index
    %34 = vector.load %arg5[%c0_16, %c0_17, %c0_18] : memref<1x256x128xbf16, #tpu.memory_space<vmem>>, vector<1x256x128xbf16>
    %35 = vector.shape_cast %34 : vector<1x256x128xbf16> to vector<256x128xbf16>
    %36 = arith.extf %35 : vector<256x128xbf16> to vector<256x128xf32>
    %37 = arith.addf %33, %36 : vector<256x128xf32>
    %cst_19 = arith.constant 0.000000e+00 : f32
    %38 = vector.broadcast %cst_19 : f32 to vector<256x128xf32>
    %39 = arith.maximumf %37, %38 : vector<256x128xf32>
    %c0_20 = arith.constant 0 : index
    %c0_21 = arith.constant 0 : index
    %40 = vector.load %arg4[%c0_20, %c0_21] : memref<128x256xbf16, #tpu.memory_space<vmem>>, vector<128x256xbf16>
    %41 = arith.truncf %39 : vector<256x128xf32> to vector<256x128xbf16>
    %cst_22 = arith.constant dense<0.000000e+00> : vector<128x128xf32>
    %42 = tpu.matmul %40, %41, %cst_22 {dimension_numbers = #tpu.dot_dimension_numbers<[1], [0], [0], [1], [0, 0, 1, 1], [], []>} : vector<128x256xbf16>, vector<256x128xbf16>, vector<128x128xf32> -> vector<128x128xf32>
    %43 = arith.index_cast %arg0 : i32 to index
    %44 = memref.load %arg1[%43] : memref<3xf32, #tpu.memory_space<smem>>
    %cst_23 = arith.constant 1.000000e+00 : f32
    %45 = arith.addf %cst_23, %44 : f32
    %46 = vector.broadcast %45 : f32 to vector<128x128xf32>
    %47 = arith.mulf %46, %30 : vector<128x128xf32>
    %48 = arith.addf %47, %42 : vector<128x128xf32>
    %49 = arith.truncf %48 : vector<128x128xf32> to vector<128x128xbf16>
    %c0_24 = arith.constant 0 : index
    %c0_25 = arith.constant 0 : index
    %c0_26 = arith.constant 0 : index
    %50 = vector.load %arg8[%c0_24, %c0_25, %c0_26] : memref<1x128x256xbf16, #tpu.memory_space<vmem>>, vector<1x128x256xbf16>
    %51 = vector.shape_cast %50 : vector<1x128x256xbf16> to vector<128x256xbf16>
    %cst_27 = arith.constant dense<0.000000e+00> : vector<128x256xf32>
    %52 = tpu.matmul %49, %51, %cst_27 {dimension_numbers = #tpu.dot_dimension_numbers<[1], [0], [0], [1], [0, 0, 1, 1], [], []>} : vector<128x128xbf16>, vector<128x256xbf16>, vector<128x256xf32> -> vector<128x256xf32>
    %c0_28 = arith.constant 0 : index
    %c0_29 = arith.constant 0 : index
    %c0_30 = arith.constant 0 : index
    %53 = vector.load %arg9[%c0_28, %c0_29, %c0_30] : memref<1x1x256xf32, #tpu.memory_space<vmem>>, vector<1x1x256xf32>
    %54 = vector.shape_cast %53 : vector<1x1x256xf32> to vector<1x256xf32>
    %55 = vector.broadcast %54 : vector<1x256xf32> to vector<128x256xf32>
    %56 = arith.addf %52, %55 : vector<128x256xf32>
    %cst_31 = arith.constant 0.000000e+00 : f32
    %57 = vector.broadcast %cst_31 : f32 to vector<128x256xf32>
    %58 = arith.maximumf %56, %57 : vector<128x256xf32>
    %59 = arith.truncf %58 : vector<128x256xf32> to vector<128x256xbf16>
    %c0_32 = arith.constant 0 : index
    %c0_33 = arith.constant 0 : index
    %c0_34 = arith.constant 0 : index
    %60 = vector.load %arg10[%c0_32, %c0_33, %c0_34] : memref<1x256x128xbf16, #tpu.memory_space<vmem>>, vector<1x256x128xbf16>
    %61 = vector.shape_cast %60 : vector<1x256x128xbf16> to vector<256x128xbf16>
    %cst_35 = arith.constant dense<0.000000e+00> : vector<128x128xf32>
    %62 = tpu.matmul %59, %61, %cst_35 {dimension_numbers = #tpu.dot_dimension_numbers<[1], [0], [0], [1], [0, 0, 1, 1], [], []>} : vector<128x256xbf16>, vector<256x128xbf16>, vector<128x128xf32> -> vector<128x128xf32>
    %c0_36 = arith.constant 0 : index
    %c0_37 = arith.constant 0 : index
    %c0_38 = arith.constant 0 : index
    %63 = vector.load %arg11[%c0_36, %c0_37, %c0_38] : memref<1x1x128xf32, #tpu.memory_space<vmem>>, vector<1x1x128xf32>
    %64 = vector.shape_cast %63 : vector<1x1x128xf32> to vector<1x128xf32>
    %65 = vector.broadcast %64 : vector<1x128xf32> to vector<128x128xf32>
    %66 = arith.addf %62, %65 : vector<128x128xf32>
    %c0_39 = arith.constant 0 : index
    %c0_40 = arith.constant 0 : index
    %67 = vector.load %arg13[%c0_39, %c0_40] : memref<128x128xf32, #tpu.memory_space<vmem>>, vector<128x128xf32>
    tpu.vector_store %arg13[%c0_39, %c0_40], %66 {strides = array<i32>} : memref<128x128xf32, #tpu.memory_space<vmem>>, vector<128x128xf32>,
    %c2_i32 = arith.constant 2 : i32
    %68 = arith.cmpi ne, %arg0, %c2_i32 : i32
    %69 = arith.extui %68 : i1 to i32
    %c0_i32_41 = arith.constant 0 : i32
    %70 = arith.cmpi ne, %69, %c0_i32_41 : i32
    scf.if %70 {
      %cst_51 = arith.constant 0.000000e+00 : f32
      %82 = vector.broadcast %cst_51 : f32 to vector<128x128xf32>
      %83 = arith.maximumf %66, %82 : vector<128x128xf32>
      %c0_52 = arith.constant 0 : index
      %c0_53 = arith.constant 0 : index
      %84 = vector.load %arg13[%c0_52, %c0_53] : memref<128x128xf32, #tpu.memory_space<vmem>>, vector<128x128xf32>
      tpu.vector_store %arg13[%c0_52, %c0_53], %83 {strides = array<i32>} : memref<128x128xf32, #tpu.memory_space<vmem>>, vector<128x128xf32>,
    } else {
    }
    %71 = tpu.iota {dimensions = array<i32: 0>} : vector<128x1xi32>
    %c32_i32 = arith.constant 32 : i32
    %72 = vector.broadcast %c32_i32 : i32 to vector<128x1xi32>
    %73 = arith.cmpi slt, %71, %72 : vector<128x1xi32>
    %c0_42 = arith.constant 0 : index
    %c0_43 = arith.constant 0 : index
    %74 = vector.load %arg13[%c0_42, %c0_43] : memref<128x128xf32, #tpu.memory_space<vmem>>, vector<128x128xf32>
    %cst_44 = arith.constant 0.000000e+00 : f32
    %75 = vector.shape_cast %73 : vector<128x1xi1> to vector<128x1xi1>
    %76 = vector.broadcast %75 : vector<128x1xi1> to vector<128x128xi1>
    %77 = vector.broadcast %cst_44 : f32 to vector<128x128xf32>
    %78 = arith.select %76, %74, %77 : vector<128x128xi1>, vector<128x128xf32>
    %c0_45 = arith.constant 0 : index
    %c0_46 = arith.constant 0 : index
    %79 = vector.load %arg13[%c0_45, %c0_46] : memref<128x128xf32, #tpu.memory_space<vmem>>, vector<128x128xf32>
    tpu.vector_store %arg13[%c0_45, %c0_46], %78 {strides = array<i32>} : memref<128x128xf32, #tpu.memory_space<vmem>>, vector<128x128xf32>,
    %c0_47 = arith.constant 0 : index
    %c0_48 = arith.constant 0 : index
    %80 = vector.load %arg13[%c0_47, %c0_48] : memref<128x128xf32, #tpu.memory_space<vmem>>, vector<128x128xf32>
    %c0_49 = arith.constant 0 : index
    %c0_50 = arith.constant 0 : index
    %81 = vector.load %arg12[%c0_49, %c0_50] : memref<128x128xf32, #tpu.memory_space<vmem>>, vector<128x128xf32>
    tpu.vector_store %arg12[%c0_49, %c0_50], %80 {strides = array<i32>} : memref<128x128xf32, #tpu.memory_space<vmem>>, vector<128x128xf32>,
    return
  }
  func.func @transform_0(%arg0: i32) -> i32 {
    %c0_i32 = arith.constant 0 : i32
    %c0_i32_0 = arith.constant 0 : i32
    return %c0_i32 : i32
  }
  func.func @transform_1(%arg0: i32) -> (i32, i32) {
    %c0_i32 = arith.constant 0 : i32
    %c0_i32_0 = arith.constant 0 : i32
    %c0_i32_1 = arith.constant 0 : i32
    return %c0_i32, %c0_i32_0 : i32, i32
  }
  func.func @transform_2(%arg0: i32) -> (i32, i32) {
    %c0_i32 = arith.constant 0 : i32
    %c0_i32_0 = arith.constant 0 : i32
    %c0_i32_1 = arith.constant 0 : i32
    return %c0_i32, %c0_i32_0 : i32, i32
  }
  func.func @transform_3(%arg0: i32) -> (i32, i32) {
    %c0_i32 = arith.constant 0 : i32
    %c0_i32_0 = arith.constant 0 : i32
    %c0_i32_1 = arith.constant 0 : i32
    return %c0_i32, %c0_i32_0 : i32, i32
  }
  func.func @transform_4(%arg0: i32) -> (i32, i32, i32) {
    %c0_i32 = arith.constant 0 : i32
    %c0_i32_0 = arith.constant 0 : i32
    %c0_i32_1 = arith.constant 0 : i32
    return %arg0, %c0_i32, %c0_i32_0 : i32, i32, i32
  }
  func.func @transform_5(%arg0: i32) -> (i32, i32, i32) {
    %c0_i32 = arith.constant 0 : i32
    %c0_i32_0 = arith.constant 0 : i32
    %c0_i32_1 = arith.constant 0 : i32
    return %arg0, %c0_i32, %c0_i32_0 : i32, i32, i32
  }
  func.func @transform_6(%arg0: i32) -> (i32, i32, i32) {
    %c0_i32 = arith.constant 0 : i32
    %c0_i32_0 = arith.constant 0 : i32
    %c0_i32_1 = arith.constant 0 : i32
    return %arg0, %c0_i32, %c0_i32_0 : i32, i32, i32
  }
  func.func @transform_7(%arg0: i32) -> (i32, i32, i32) {
    %c0_i32 = arith.constant 0 : i32
    %c0_i32_0 = arith.constant 0 : i32
    %c0_i32_1 = arith.constant 0 : i32
    return %arg0, %c0_i32, %c0_i32_0 : i32, i32, i32
  }
  func.func @transform_8(%arg0: i32) -> (i32, i32, i32) {
    %c0_i32 = arith.constant 0 : i32
    %c0_i32_0 = arith.constant 0 : i32
    %c0_i32_1 = arith.constant 0 : i32
    return %arg0, %c0_i32, %c0_i32_0 : i32, i32, i32
  }
  func.func @transform_9(%arg0: i32) -> (i32, i32, i32) {
    %c0_i32 = arith.constant 0 : i32
    %c0_i32_0 = arith.constant 0 : i32
    %c0_i32_1 = arith.constant 0 : i32
    return %arg0, %c0_i32, %c0_i32_0 : i32, i32, i32
  }
  func.func @transform_10(%arg0: i32) -> (i32, i32, i32) {
    %c0_i32 = arith.constant 0 : i32
    %c0_i32_0 = arith.constant 0 : i32
    %c0_i32_1 = arith.constant 0 : i32
    return %arg0, %c0_i32, %c0_i32_0 : i32, i32, i32
  }
  func.func @transform_11(%arg0: i32) -> (i32, i32) {
    %c0_i32 = arith.constant 0 : i32
    %c0_i32_0 = arith.constant 0 : i32
    %c0_i32_1 = arith.constant 0 : i32
    return %c0_i32, %c0_i32_0 : i32, i32
  }
}

</mosaic_0001>

<bundles_post_ra>
// kernel: tpu_custom_call.1
= control target key start
LH: loop header
LB: loop body
LE: loop exit
PB: predicated region body
PF: predicated region fallthrough
CT: control target
= control target key end

     0   :  { %s3835_s0 = inlined_call_operand.hbm [shape: f32[3], index: 0, kind: input, shape index: {}]   ;;  %s3836_s1 = inlined_call_operand.hbm [shape: f32[128,128], index: 1, kind: input, shape index: {}]   ;;  %s3837_s2 = inlined_call_operand.hbm [shape: bf16[256,128], index: 2, kind: input, shape index: {}]   ;;  %s3838_s3 = inlined_call_operand.hbm [shape: bf16[128,256], index: 3, kind: input, shape index: {}]   ;;  %s3839_s4 = inlined_call_operand.hbm [shape: bf16[3,256,128], index: 4, kind: input, shape index: {}]   ;;  %s3840_s5 = inlined_call_operand.vmem [shape: f32[3,1,128], index: 5, kind: input, shape index: {}]   ;;  %s3841_s6 = inlined_call_operand.vmem [shape: f32[3,1,128], index: 6, kind: input, shape index: {}]   ;;  %s3842_s7 = inlined_call_operand.hbm [shape: bf16[3,128,256], index: 7, kind: input, shape index: {}]   ;;  %s3843_s8 = inlined_call_operand.vmem [shape: f32[3,1,256], index: 8, kind: input, shape index: {}]   ;;  %s3844_s9 = inlined_call_operand.hbm [shape: bf16[3,256,128], index: 9, kind: input, shape index: {}]   ;;  %s3845_s10 = inlined_call_operand.vmem [shape: f32[3,1,128], index: 10, kind: input, shape index: {}]   ;;  %s3846_s11 = inlined_call_operand.hbm [shape: f32[128,128], index: 11, kind: output, shape index: {}]  }
   0x1   :  { %3867 = sst [smem:[#allocation32_spill]] %s3835_s0 }
   0x2   :  { %3868 = sst [smem:[#allocation33_spill]] %s3837_s2 }
   0x3   :  { %3869 = sst [smem:[#allocation34_spill]] %s3839_s4 }
   0x4   :  { %3870 = sst [smem:[#allocation35_spill]] %s3841_s6 }
   0x5   :  { %3871 = sst [smem:[#allocation36_spill]] %s3843_s8 }
   0x6   :  { %3872 = sst [smem:[#allocation37_spill]] %s3845_s10 }
   0x7   :  { %3873 = sst [smem:[#allocation38_spill]] %s3846_s11 }
   0x8   :  { %16 = vsyncpa [#allocation6], 0 }
   0x9   :  { %17 = vsyncpa [#allocation4], 0 }
   0xa   :  { %18 = vsyncpa [#allocation9], 0 }
   0xb   :  { %19 = vsyncpa [#allocation12], 0 }
   0xc   :  { %21 = vsyncpa [#allocation12 + $0x1], 0 }
   0xd   :  { %22 = vsyncpa [#allocation15], 0 }
   0xe   :  { %24 = vsyncpa [#allocation15 + $0x1], 0 }
   0xf   :  { %25 = vsyncpa [#allocation5], 0  ;;  %s3173_s17 = smov 0   ;;  %s3175_s18 = smov 0  }
  0x10   :  { %s3177_s19 = smov 0   ;;  %s3179_s20 = smov 0  }
  0x11 LB: > { %s3192_s21 = sadd.s32 4294967295, %s3095_s20   ;;  %p135_p0 = scmp.ne.s32.totalorder %s3087_s18, %s3083_s17  ;;  %s3095_s20 = sphi %s3179_s20, %s3919_s20   ;;  %s3091_s19 = sphi %s3177_s19, %s3923_s19   ;;  %s3087_s18 = sphi %s3175_s18, %s3922_s18   ;;  %s3083_s17 = sphi %s3173_s17, %s3921_s17  }
  0x12   : > { %p3854_p1 = scmp.eq.s32.totalorder %s3192_s21, 0  ;;  %p2280_p2 = scmp.ge.s32.totalorder %s3095_s20, 1 }
  0x13   : > { %p323_p3 = scmp.lt.s32.totalorder %s3095_s20, 4  ;;  %s3097_s24 = smov [#allocation8]  }
  0x14   : > { %p3201_p5 = por %p3854_p1, %p135_p0  ;;  %s357_s25 = sshll.u32 %s3097_s24, 4  ;;  %s358_s25 = int_to_ptr.vmem [resolvable:$true] %s357_s25 }
  0x15   : > { %p3205_p6 = pnand %p2280_p2, %p323_p3  ;;  %s3218_s27 = sadd.s32 1, %s3095_s20  }
  0x16   : > { %s3874_s22 = scalar_select %p3201_p5, 1, 0 }
  0x17   : > { %s3875_s23 = scalar_select %p3205_p6, 1, 0 }
  0x18   : > { %p2683_p7 = pneg %p3205_p6  ;;  %3877 = sst [smem:[#allocation23_spill]] %s3218_s27 }
  0x19   : > { %s122_s28 = sadd.s32 1, %s3091_s19  ;;  %s119_s29 = ssub.s32 %s3095_s20, %s3218_s27 }
  0x1a   : > { %p3213_p8 = pnand %p2683_p7, %p3854_p1  ;;  %s2855_s30 = scalar_lea.vmem %s358_s25, 2048 }
  0x1b   : > { %p2856_p10 = scmp.ne.s32.totalorder %s358_s25, %s2855_s30  ;;  %p2863_p13 = scmp.lt.s32.totalorder %s358_s25, %s358_s25 }
  0x1c   : > { %s3876_s26 = scalar_select %p3213_p8, 1, 0 }
  0x1d   : > { %p3855_p9 = pneg %p3213_p8  ;;  %p2864_p0 = scmp.lt.s32.totalorder %s2855_s30, %s2855_s30 }
  0x1f   : > { %p2858_p11 = pnand %p2856_p10, %p3855_p9  ;;  %p2865_p2 = por %p2864_p0, %p2863_p13 }
  0x21   : > { %p2859_p12 = pneg %p2858_p11 }
  0x23   : > { %p2866_p3 = pnand %p2865_p2, %p2859_p12 }
  0x25   : > { %2869 = shalt.err (!%p2866_p3)
}
  0x26   : > { %s3850_s12 = smov 64   ;;  %s3852_s13 = smov 4  }
  0x27   : > { %s3878_s2 = sld [smem:[#allocation33_spill]]  ;;  %p120_p7 = scmp.eq.s32.totalorder %s119_s29, 0 }
  0x28   : > { %p129_p10 = scmp.ne.s32.totalorder %s3091_s19, %s3087_s18  ;;  %p130_p11 = scmp.eq.s32.totalorder %s3095_s20, 0 }
  0x29   : > { %p2710_p12 = scmp.lt.s32.totalorder %s3095_s20, 3  ;;  %s384_s17 = sand.u32 1, %s3095_s20  }
  0x2a   : > { %s3241_s16 = scalar_select %p120_p7, %s3091_s19, %s122_s28  }
  0x2b   : > { %p131_p13 = por %p130_p11, %p129_p10  ;;  %s3849_s24 = sand.u32 1, %s3091_s19  }
  0x2c   : > { %3879 = sst [smem:[#allocation24_spill]] %s3241_s16  ;;  %s3247_s30 = sshll.u32 %s3849_s24, 7 }
  0x2d   : > { %2692 = dma.hbm_to_vmem [thread:$0]  (!%p3213_p8), %s3878_s2, 2048, %s358_s25, [#allocation9], %s3850_s12, %s3850_s12, %s3852_s13  }
  0x2e   : > { %s3250_s27 = sshll.u32 %s3095_s20, 11  ;;  %s3880_s4 = sld [smem:[#allocation34_spill]] }
  0x2f   : > { %s388_s28 = scalar_lea.vmem [#allocation11], %s3247_s30  ;;  %p3259_p0 = pnand %p2710_p12, %p131_p13 }
  0x30   : > { %s395_s29 = sshll.u32 %s388_s28, 4  ;;  %s3265_s20 = scalar_lea.sflag [#allocation12], %s384_s17  ;;  %s3263_s29 = int_to_ptr.vmem [resolvable:$true] %s395_s29 }
  0x31   : > { %p3271_p3 = pneg %p3259_p0 }
  0x34   : > { %s3256_s25 = scalar_lea.hbm %s3880_s4, %s3250_s27  ;;  %s2875_s24 = scalar_lea.hbm %s3880_s4, 6144 }
  0x35   : > { %s2870_s15 = scalar_lea.hbm %s3256_s25, 2048  ;;  %p2876_p11 = scmp.lt.s32.totalorder %s3256_s25, %s3880_s4 }
  0x36   : > { %p2871_p2 = scmp.ne.s32.totalorder %s3256_s25, %s2870_s15  ;;  %p2877_p12 = scmp.lt.s32.totalorder %s2875_s24, %s2870_s15 }
  0x38   : > { %p2873_p7 = pnand %p3271_p3, %p2871_p2  ;;  %p2878_p13 = por %p2877_p12, %p2876_p11 }
  0x3a   : > { %p2874_p10 = pneg %p2873_p7 }
  0x3c   : > { %p2879_p4 = pnand %p2878_p13, %p2874_p10 }
  0x3e   : > { %2882 = shalt.err (!%p2879_p4)
}
  0x3f   : > { %s2883_s17 = scalar_lea.vmem %s3263_s29, 2048  ;;  %s3100_s2 = smov [#allocation11]  }
  0x40   : > { %p2884_p1 = scmp.ne.s32.totalorder %s3263_s29, %s2883_s17  ;;  %s2888_s11 = sshll.u32 %s3100_s2, 4  ;;  %s2889_s11 = int_to_ptr.vmem [resolvable:$false] %s2888_s11 }
  0x41   : > { %s2890_s28 = scalar_lea.vmem %s2889_s11, 4096  ;;  %p2891_p9 = scmp.lt.s32.totalorder %s3263_s29, %s2889_s11 }
  0x42   : > { %p2886_p2 = pnand %p2884_p1, %p3271_p3  ;;  %p2892_p5 = scmp.lt.s32.totalorder %s2890_s28, %s2883_s17 }
  0x44   : > { %p2887_p7 = pneg %p2886_p2  ;;  %p2893_p6 = por %p2892_p5, %p2891_p9 }
  0x46   : > { %p2894_p8 = pnand %p2893_p6, %p2887_p7 }
  0x48   : > { %2897 = shalt.err (!%p2894_p8)
}
  0x49   : > { %s3883_s12 = smov 4   ;;  %s3884_s13 = smov 64  }
  0x4a   : > { %2699 = dma.hbm_to_vmem [thread:$0]  (!%p3259_p0), %s3256_s25, 2048, %s3263_s29, %s3265_s20, %s3884_s13, %s3884_s13, %s3883_s12  }
  0x4b   : > { %s3101_s24 = smov [#allocation3]   ;;  %p3885_p1 = scmp.ne.s32.totalorder %s3876_s26, 0 }
  0x4c   : > { %s3886_s0 = sld [smem:[#allocation32_spill]]  ;;  %s3102_s17 = smov [#allocation7]  }
  0x4d   : > { %s344_s11 = sshll.u32 %s3102_s17, 4  ;;  %p3887_p5 = pneg %p3885_p1  ;;  %s345_s11 = int_to_ptr.vmem [resolvable:$true] %s344_s11 }
  0x4e   : > { %s2920_s28 = scalar_lea.vmem %s345_s11, 2048  ;;  %p2928_p9 = scmp.lt.s32.totalorder %s345_s11, %s345_s11 }
  0x4f   : > { %p2921_p4 = scmp.ne.s32.totalorder %s345_s11, %s2920_s28  ;;  %p2929_p10 = scmp.lt.s32.totalorder %s2920_s28, %s2920_s28 }
  0x51   : > { %p2923_p6 = pnand %p2921_p4, %p3887_p5  ;;  %p2930_p11 = por %p2929_p10, %p2928_p9 }
  0x52   : > { %2686 = dma.hbm_to_smem (!%p3885_p1), %s3886_s0, 16, %s3101_s24, [#allocation6]  }
  0x53   : > { %p2924_p8 = pneg %p2923_p6 }
  0x55   : > { %p2931_p12 = pnand %p2930_p11, %p2924_p8 }
  0x57   : > { %2934 = shalt.err (!%p2931_p12)
}
  0x58   : > { %s3103_s25 = smov 128   ;;  %s3104_s29 = smov 8  }
  0x59   : > { %2689 = dma.hbm_to_vmem [thread:$0]  (!%p3885_p1), %s3836_s1, 2048, %s345_s11, [#allocation4], %s3103_s25, %s3103_s25, %s3104_s29  }
  0x5a   : > { %s3105_s15 = smov [#allocation10]   ;;  %s3317_s4 = scalar_lea.hbm %s3842_s7, %s3250_s27 }
  0x5b   : > { %s370_s17 = sshll.u32 %s3105_s15, 4  ;;  %s421_s16 = scalar_lea.vmem [#allocation13], %s3247_s30  ;;  %s371_s17 = int_to_ptr.vmem [resolvable:$true] %s370_s17 }
  0x5c   : > { %s428_s10 = sshll.u32 %s421_s16, 4  ;;  %s2946_s6 = scalar_lea.vmem %s371_s17, 2048  ;;  %s429_s10 = int_to_ptr.vmem [resolvable:$true] %s428_s10 }
  0x5d   : > { %p2947_p13 = scmp.ne.s32.totalorder %s371_s17, %s2946_s6  ;;  %p3888_p2 = pmov %p3887_p5 }
  0x5e   : > { %p2954_p5 = scmp.lt.s32.totalorder %s371_s17, %s371_s17  ;;  %p2955_p6 = scmp.lt.s32.totalorder %s2946_s6, %s2946_s6 }
  0x5f   : > { %p2949_p7 = pnand %p2947_p13, %p3888_p2 }
  0x60   : > { %p2956_p8 = por %p2955_p6, %p2954_p5 }
  0x61   : > { %p2950_p4 = pneg %p2949_p7 }
  0x63   : > { %p2957_p9 = pnand %p2956_p8, %p2950_p4 }
  0x65   : > { %2960 = shalt.err (!%p2957_p9)
}
  0x66   : > { %2695 = dma.hbm_to_vmem [thread:$0]  (!%p3885_p1), %s3838_s3, 2048, %s371_s17, [#allocation9], %s3103_s25, %s3103_s25, %s3104_s29  }
  0x67   : > { %s2961_s16 = scalar_lea.hbm %s3317_s4, 2048  ;;  %s2966_s26 = scalar_lea.hbm %s3842_s7, 6144 }
  0x68   : > { %p2962_p10 = scmp.ne.s32.totalorder %s3317_s4, %s2961_s16  ;;  %p2967_p13 = scmp.lt.s32.totalorder %s3317_s4, %s3842_s7 }
  0x69   : > { %p2968_p2 = scmp.lt.s32.totalorder %s2966_s26, %s2961_s16 }
  0x6a   : > { %p2964_p11 = pnand %p2962_p10, %p3271_p3 }
  0x6b   : > { %p2969_p7 = por %p2968_p2, %p2967_p13 }
  0x6c   : > { %p2965_p12 = pneg %p2964_p11 }
  0x6e   : > { %p2970_p4 = pnand %p2969_p7, %p2965_p12 }
  0x70   : > { %2973 = shalt.err (!%p2970_p4)
}
  0x71   : > { %s2974_s28 = scalar_lea.vmem %s429_s10, 2048  ;;  %s3106_s17 = smov [#allocation13]  }
  0x72   : > { %p2975_p1 = scmp.ne.s32.totalorder %s429_s10, %s2974_s28  ;;  %s2979_s0 = sshll.u32 %s3106_s17, 4  ;;  %s2980_s0 = int_to_ptr.vmem [resolvable:$false] %s2979_s0 }
  0x73   : > { %s2981_s11 = scalar_lea.vmem %s2980_s0, 4096  ;;  %p2982_p8 = scmp.lt.s32.totalorder %s429_s10, %s2980_s0 }
  0x74   : > { %p2977_p5 = pnand %p2975_p1, %p3271_p3  ;;  %p2983_p9 = scmp.lt.s32.totalorder %s2981_s11, %s2974_s28 }
  0x76   : > { %p2978_p6 = pneg %p2977_p5  ;;  %p2984_p10 = por %p2983_p9, %p2982_p8 }
  0x78   : > { %p2985_p11 = pnand %p2984_p10, %p2978_p6 }
  0x7a   : > { %2988 = shalt.err (!%p2985_p11)
}
  0x7b   : > { %2702 = dma.hbm_to_vmem [thread:$0]  (!%p3259_p0), %s3317_s4, 2048, %s429_s10, %s3265_s20, %s3103_s25, %s3103_s25, %s3104_s29  }
  0x7c   : > { %s3355_s24 = scalar_lea.hbm %s3844_s9, %s3250_s27  ;;  %s449_s26 = scalar_lea.vmem [#allocation14], %s3247_s30 }
  0x7d   : > { %s456_s2 = sshll.u32 %s449_s26, 4  ;;  %s3889_s15 = sand.u32 1, %s3091_s19   ;;  %s3358_s2 = int_to_ptr.vmem [resolvable:$true] %s456_s2 }
  0x7e   : > { %s446_s28 = scalar_lea.sflag [#allocation15], %s3889_s15  ;;  %s2989_s17 = scalar_lea.hbm %s3355_s24, 2048 }
  0x7f   : > { %p2990_p12 = scmp.ne.s32.totalorder %s3355_s24, %s2989_s17  ;;  %s2994_s20 = scalar_lea.hbm %s3844_s9, 6144 }
  0x80   : > { %p2995_p7 = scmp.lt.s32.totalorder %s3355_s24, %s3844_s9  ;;  %p2996_p4 = scmp.lt.s32.totalorder %s2994_s20, %s2989_s17 }
  0x81   : > { %p2992_p13 = pnand %p2990_p12, %p3271_p3 }
  0x82   : > { %p2997_p1 = por %p2996_p4, %p2995_p7 }
  0x83   : > { %p2993_p2 = pneg %p2992_p13 }
  0x85   : > { %p2998_p5 = pnand %p2997_p1, %p2993_p2 }
  0x87   : > { %3001 = shalt.err (!%p2998_p5)
}
  0x88   : > { %s3002_s30 = scalar_lea.vmem %s3358_s2, 2048  ;;  %s3107_s29 = smov [#allocation14]  }
  0x89   : > { %p3003_p6 = scmp.ne.s32.totalorder %s3358_s2, %s3002_s30  ;;  %s3007_s0 = sshll.u32 %s3107_s29, 4  ;;  %s3008_s0 = int_to_ptr.vmem [resolvable:$false] %s3007_s0 }
  0x8a   : > { %s3009_s11 = scalar_lea.vmem %s3008_s0, 4096  ;;  %p3010_p10 = scmp.lt.s32.totalorder %s3358_s2, %s3008_s0 }
  0x8b   : > { %p3005_p8 = pnand %p3003_p6, %p3271_p3  ;;  %p3011_p11 = scmp.lt.s32.totalorder %s3009_s11, %s3002_s30 }
  0x8d   : > { %p3006_p9 = pneg %p3005_p8  ;;  %p3012_p12 = por %p3011_p11, %p3010_p10 }
  0x8f   : > { %p3013_p13 = pnand %p3012_p12, %p3006_p9 }
  0x91   : > { %3016 = shalt.err (!%p3013_p13)
}
  0x92   : > { %2705 = dma.hbm_to_vmem [thread:$0]  (!%p3259_p0), %s3355_s24, 2048, %s3358_s2, %s446_s28, %s3884_s13, %s3884_s13, %s3883_s12  }
  0x93   : > { %p3890_p3 = scmp.ne.s32.totalorder %s3875_s23, 0 }
  0x95   : > { %474 = sbr.rel (%p3890_p3) target bundleno = 1302 (0x516), region = 64 }
  0x9a   : > { %p3891_p2 = scmp.eq.s32.totalorder %s3192_s21, 0 }
  0x9c   : > { %3058 = dma.done.wait (%p3891_p2), [#allocation6], 16   ;;  %p3892_p7 = pmov %p3891_p2 }
  0x9d   : > { %p3893_p4 = pmov %p3891_p2 }
  0x9e   : > { %3060 = vsyncadd (%p3892_p7), [#allocation6], 4294967280 }
  0x9f   : > { %3062 = dma.done.wait (%p3893_p4), [#allocation4], 2048   ;;  %p3894_p1 = pmov %p3891_p2 }
  0xa1   : > { %3064 = vsyncadd (%p3894_p1), [#allocation4], 4294965248  ;;  %p3895_p5 = pmov %p3894_p1 }
  0xa2   : > { %p3896_p0 = pmov %p3894_p1 }
  0xa3   : > { %3066 = dma.done.wait (%p3895_p5), [#allocation9], 4096  }
  0xa4   : > { %3068 = vsyncadd (%p3896_p0), [#allocation9], 4294963200  ;;  %s492_s23 = sand.u32 1, %s3192_s21   ;;  %s494_s14 = sand.u32 1, %s3087_s18  }
  0xa5   : > { %s2300_s8 = sshll.u32 %s494_s14, 7  ;;  %s493_s12 = scalar_lea.sflag [#allocation12], %s492_s23 }
  0xa6   : > { %s3401_s13 = scalar_lea.vmem [#allocation11], %s2300_s8  ;;  %p3897_p6 = scmp.ne.s32.totalorder %s3874_s22, 0 }
  0xa8   : > { %3070 = dma.done.wait (%p3897_p6), %s493_s12, 4096  }
  0xa9   : > { %3072 = vsyncadd (%p3897_p6), %s493_s12, 4294963200  ;;  %s3407_s16 = scalar_lea.vmem [#allocation13], %s2300_s8  ;;  %s511_s6 = scalar_lea.sflag [#allocation15], %s494_s14 }
  0xaa   : > { %s3409_s24 = scalar_lea.vmem [#allocation14], %s2300_s8 }
  0xab   : > { %3074 = dma.done.wait (%p3897_p6), %s511_s6, 2048  }
  0xac   : > { %3076 = vsyncadd (%p3897_p6), %s511_s6, 4294965248 }
  0xad   : > { %519 = sfence }
  0xae   : > { %p572_p8 = scmp.lt.s32.totalorder %s3192_s21, 2  ;;  %s3898_s10 = sld [smem:[#allocation35_spill]] }
  0xaf   : > { %s3899_s30 = sld [smem:[#allocation37_spill]]  ;;  %p3901_p9 = scmp.ne.s32.totalorder %s3192_s21, 0 }
  0xb0   : > { %s3417_s26 = scalar_select %p572_p8, %s3192_s21, 2 }
  0xb1   : > { %s3900_s23 = sld [smem:[#allocation36_spill]] }
  0xb2   : > { %s574_s28 = scalar_lea.vmem %s3840_s5, %s3417_s26  ;;  %s2303_s22 = sshll.u32 %s3417_s26, 1 }
  0xb3   : > { %589 = sbr.rel (%p3901_p9) target bundleno = 193 (0xc1), region = 96 }
  0xb4   : > { %s577_s20 = scalar_lea.vmem %s3898_s10, %s3417_s26 }
  0xb5   : > { %s584_s29 = scalar_lea.vmem %s3899_s30, %s3417_s26 }
  0xb7   : > { %s3435_s14 = scalar_lea.vmem %s3900_s23, %s2303_s22 }
  0xb8   : > { %v590_v0 = vld [vmem:[#allocation7] sm:$0xff]  ;;  %v591_v1 = vld [vmem:[#allocation7 + $0x8] sm:$0xff]  ;;  %v592_v2 = vld [vmem:[#allocation7 + $0x10] sm:$0xff] }
  0xb9   : > { %606 = vst [vmem:[#allocation2 + $0x30] sm:$0xff] %v590_v0  ;;  %607 = vst [vmem:[#allocation2] sm:$0xff] %v591_v1  ;;  %v593_v3 = vld [vmem:[#allocation7 + $0x18] sm:$0xff]  ;;  %v594_v4 = vld [vmem:[#allocation7 + $0x20] sm:$0xff] }
  0xba   : > { %608 = vst [vmem:[#allocation2 + $0x58] sm:$0xff] %v592_v2  ;;  %v595_v5 = vld [vmem:[#allocation7 + $0x28] sm:$0xff]  ;;  %609 = vst [vmem:[#allocation2 + $0x18] sm:$0xff] %v593_v3  ;;  %v596_v6 = vld [vmem:[#allocation7 + $0x30] sm:$0xff] }
  0xbb   : > { %610 = vst [vmem:[#allocation2 + $0x50] sm:$0xff] %v594_v4  ;;  %611 = vst [vmem:[#allocation2 + $0x68] sm:$0xff] %v595_v5  ;;  %v597_v7 = vld [vmem:[#allocation7 + $0x38] sm:$0xff]  ;;  %v598_v8 = vld [vmem:[#allocation7 + $0x40] sm:$0xff] }
  0xbc   : > { %612 = vst [vmem:[#allocation2 + $0x8] sm:$0xff] %v596_v6  ;;  %613 = vst [vmem:[#allocation2 + $0x48] sm:$0xff] %v597_v7  ;;  %v599_v9 = vld [vmem:[#allocation7 + $0x48] sm:$0xff]  ;;  %v600_v10 = vld [vmem:[#allocation7 + $0x50] sm:$0xff] }
  0xbd   : > { %614 = vst [vmem:[#allocation2 + $0x40] sm:$0xff] %v598_v8  ;;  %v601_v11 = vld [vmem:[#allocation7 + $0x58] sm:$0xff]  ;;  %615 = vst [vmem:[#allocation2 + $0x20] sm:$0xff] %v599_v9  ;;  %v602_v12 = vld [vmem:[#allocation7 + $0x60] sm:$0xff] }
  0xbe   : > { %616 = vst [vmem:[#allocation2 + $0x10] sm:$0xff] %v600_v10  ;;  %617 = vst [vmem:[#allocation2 + $0x38] sm:$0xff] %v601_v11  ;;  %v603_v13 = vld [vmem:[#allocation7 + $0x68] sm:$0xff]  ;;  %v604_v14 = vld [vmem:[#allocation7 + $0x70] sm:$0xff] }
  0xbf   : > { %618 = vst [vmem:[#allocation2 + $0x60] sm:$0xff] %v602_v12  ;;  %619 = vst [vmem:[#allocation2 + $0x70] sm:$0xff] %v603_v13  ;;  %v605_v15 = vld [vmem:[#allocation7 + $0x78] sm:$0xff] }
  0xc0   : > { %620 = vst [vmem:[#allocation2 + $0x78] sm:$0xff] %v604_v14  ;;  %621 = vst [vmem:[#allocation2 + $0x28] sm:$0xff] %v605_v15 }
  0xc1 PF: > { %v3439_v16 = vld [vmem:[#allocation2 + $0x30] sm:$0xff]  ;;  %v3441_v17 = vld [vmem:[#allocation2] sm:$0xff]  ;;  %v3443_v18 = vld [vmem:[#allocation2 + $0x58] sm:$0xff]  ;;  %p2370_p10 = scmp.eq.s32.totalorder %s3192_s21, 2 }
  0xc2   : > { %v3445_v19 = vld [vmem:[#allocation2 + $0x18] sm:$0xff]  ;;  %v638_v20 = vadd.f32 %v3441_v17, %v3439_v16  ;;  %v660_v21 = vmul.f32 %v3439_v16, %v3439_v16  ;;  %v661_v22 = vmul.f32 %v3441_v17, %v3441_v17  ;;  %v662_v23 = vmul.f32 %v3443_v18, %v3443_v18  ;;  %v3455_v24 = vld [vmem:[#allocation2 + $0x50] sm:$0xff]  ;;  %v3460_v28 = vld [vmem:[#allocation2 + $0x68] sm:$0xff] }
  0xc3   : > { %v663_v26 = vmul.f32 %v3445_v19, %v3445_v19  ;;  %v3463_v30 = vld [vmem:[#allocation2 + $0x8] sm:$0xff]  ;;  %v664_v31 = vmul.f32 %v3455_v24, %v3455_v24  ;;  %v2762_v34 = vld [vmem:[#allocation8] sm:$0xff]   ;;  %v665_v35 = vmul.f32 %v3460_v28, %v3460_v28 }
  0xc4   : > { %v639_v25 = vadd.f32 %v638_v20, %v3443_v18  ;;  %v676_v27 = vadd.f32 %v661_v22, %v660_v21  ;;  %v3470_v37 = vld [vmem:[#allocation2 + $0x48] sm:$0xff]  ;;  %2625 = vmatprep.mubr.bf16.mxu0 %v2762_v34  ;;  %v666_v39 = vmul.f32 %v3463_v30, %v3463_v30  ;;  %v3475_v41 = vld [vmem:[#allocation2 + $0x40] sm:$0xff] }
  0xc5   : > { %v667_v43 = vmul.f32 %v3470_v37, %v3470_v37  ;;  %v3480_v45 = vld [vmem:[#allocation2 + $0x20] sm:$0xff]  ;;  %v668_v47 = vmul.f32 %v3475_v41, %v3475_v41  ;;  %v3485_v49 = vld [vmem:[#allocation2 + $0x10] sm:$0xff]  ;;  %v633_v53 = vld [vmem:[#allocation2 + $0x38] sm:$0xff] }
  0xc6   : > { %v640_v29 = vadd.f32 %v639_v25, %v3445_v19  ;;  %v677_v32 = vadd.f32 %v676_v27, %v662_v23  ;;  %v669_v51 = vmul.f32 %v3480_v45, %v3480_v45  ;;  %v634_v55 = vld [vmem:[#allocation2 + $0x60] sm:$0xff]  ;;  %v670_v56 = vmul.f32 %v3485_v49, %v3485_v49  ;;  %v635_v58 = vld [vmem:[#allocation2 + $0x70] sm:$0xff] }
  0xc7   : > { %v671_v60 = vmul.f32 %v633_v53, %v633_v53  ;;  %v636_v62 = vld [vmem:[#allocation2 + $0x78] sm:$0xff]  ;;  %v672_v0 = vmul.f32 %v634_v55, %v634_v55  ;;  %v673_v3 = vmul.f32 %v635_v58, %v635_v58  ;;  %v637_v5 = vld [vmem:[#allocation2 + $0x28] sm:$0xff] }
  0xc8   : > { %v641_v33 = vadd.f32 %v640_v29, %v3455_v24  ;;  %v678_v36 = vadd.f32 %v677_v32, %v663_v26  ;;  %v674_v7 = vmul.f32 %v636_v62, %v636_v62  ;;  %v675_v10 = vmul.f32 %v637_v5, %v637_v5 }
  0xca   : > { %v642_v38 = vadd.f32 %v641_v33, %v3460_v28  ;;  %v679_v40 = vadd.f32 %v678_v36, %v664_v31 }
  0xcc   : > { %v643_v42 = vadd.f32 %v642_v38, %v3463_v30  ;;  %v680_v44 = vadd.f32 %v679_v40, %v665_v35 }
  0xce   : > { %v644_v46 = vadd.f32 %v643_v42, %v3470_v37  ;;  %v681_v48 = vadd.f32 %v680_v44, %v666_v39  ;;  %v709_v42 = vlaneseq  ;;  %v701_v44 = vld [vmem:[%s574_s28] sm:$0x1] }
  0xd0   : > { %v645_v50 = vadd.f32 %v644_v46, %v3475_v41  ;;  %v682_v52 = vadd.f32 %v681_v48, %v667_v43  ;;  %v3494_v43 = vshrl.u32 %v709_v42, 7  ;;  %v2776_v42 = vld [vmem:[#allocation8 + $0x70] sm:$0xff]  }
  0xd2   : > { %v646_v54 = vadd.f32 %v645_v50, %v3480_v45  ;;  %v683_v57 = vadd.f32 %v682_v52, %v668_v47  ;;  %3902 = vst [vmem:[#allocation25_spill] sm:$0xff] %v3494_v43  ;;  %v3502_v46 = vsub.s32 0, %v3494_v43  ;;  %v705_v50 = vld [vmem:[%s577_s20] sm:$0x1] }
  0xd4   : > { %v647_v59 = vadd.f32 %v646_v54, %v3485_v49  ;;  %v684_v61 = vadd.f32 %v683_v57, %v669_v51  ;;  %3903 = vst [vmem:[#allocation26_spill] sm:$0xff] %v3502_v46 }
  0xd6   : > { %v648_v63 = vadd.f32 %v647_v59, %v633_v53  ;;  %v685_v1 = vadd.f32 %v684_v61, %v670_v56 }
  0xd8   : > { %v649_v2 = vadd.f32 %v648_v63, %v634_v55  ;;  %v686_v4 = vadd.f32 %v685_v1, %v671_v60 }
  0xda   : > { %v650_v6 = vadd.f32 %v649_v2, %v635_v58  ;;  %v687_v8 = vadd.f32 %v686_v4, %v672_v0 }
  0xdc   : > { %v651_v9 = vadd.f32 %v650_v6, %v636_v62  ;;  %v688_v11 = vadd.f32 %v687_v8, %v673_v3 }
  0xde   : > { %v652_v12 = vadd.f32 %v651_v9, %v637_v5  ;;  %v689_v13 = vadd.f32 %v688_v11, %v674_v7 }
  0xe0   : > { %v653_v14 = vrot.slane %v652_v12, 4  ;;  %v690_v15 = vadd.f32 %v689_v13, %v675_v10 }
  0xe2   : > { %v654_v20 = vadd.f32 %v653_v14, %v652_v12  ;;  %v691_v21 = vrot.slane %v690_v15, 4 }
  0xe4   : > { %v655_v22 = vrot.slane %v654_v20, 2  ;;  %v692_v23 = vadd.f32 %v691_v21, %v690_v15 }
  0xe6   : > { %v656_v25 = vadd.f32 %v655_v22, %v654_v20  ;;  %v693_v26 = vrot.slane %v692_v23, 2 }
  0xe8   : > { %v657_v27 = vrot.slane %v656_v25, 1  ;;  %v694_v29 = vadd.f32 %v693_v26, %v692_v23 }
  0xea   : > { %v658_v31 = vadd.f32 %v657_v27, %v656_v25  ;;  %v695_v32 = vrot.slane %v694_v29, 1  ;;  %v2763_v27 = vld [vmem:[#allocation8 + $0x8] sm:$0xff]  }
  0xec   : > { %v659_v33 = vmul.f32 0.03125, %v658_v31  ;;  %v696_v34 = vadd.f32 %v695_v32, %v694_v29  ;;  %v2766_v29 = vld [vmem:[#allocation8 + $0x20] sm:$0xff]   ;;  %v2767_v31 = vld [vmem:[#allocation8 + $0x28] sm:$0xff]   ;;  %v2768_v32 = vld [vmem:[#allocation8 + $0x30] sm:$0xff]  }
  0xee   : > { %v698_v35 = vmul.f32 %v659_v33, %v659_v33  ;;  %v697_v36 = vmul.f32 0.03125, %v696_v34  ;;  %v2770_v34 = vld [vmem:[#allocation8 + $0x40] sm:$0xff]  }
  0xf0   : > { %v699_v38 = vsub.f32 %v697_v36, %v698_v35  ;;  %v2771_v35 = vld [vmem:[#allocation8 + $0x48] sm:$0xff]   ;;  %v2772_v36 = vld [vmem:[#allocation8 + $0x50] sm:$0xff]  }
  0xf2   : > { %v700_v39 = vmax.f32 %v699_v38, 0.0  ;;  %v2773_v38 = vld [vmem:[#allocation8 + $0x58] sm:$0xff]  }
  0xf4   : > { %v702_v40 = vadd.f32 1e-05, %v700_v39  ;;  %v2774_v39 = vld [vmem:[#allocation8 + $0x60] sm:$0xff]  }
  0xf6   : > { %2842 = vrsqrt.f32 %v702_v40  ;;  %v2775_v40 = vld [vmem:[#allocation8 + $0x68] sm:$0xff]  }
 0x103   : > { %v2843_v47 = vpop.eup %2842 }
 0x104   : > { %v704_v48 = vmul.f32 %v2843_v47, %v701_v44  ;;  %v2777_v44 = vld [vmem:[#allocation8 + $0x78] sm:$0xff]   ;;  %v2780_v47 = vld [vmem:[#allocation10 + $0x4] ss:$8 sps:$4 sm:$0xff]  }
 0x105   : > { %1289 = vmatprep.mubr.bf16.mxu1 %v2780_v47 }
 0x106   : > { %v706_v51 = vmul.f32 %v704_v48, %v659_v33  ;;  %v712_v52 = vrot.slane %v704_v48, %v3502_v46  ;;  %v2769_v33 = vld [vmem:[#allocation8 + $0x38] sm:$0xff]   ;;  %v2442_v48 = vld [vmem:[%s3401_s13 + $0x8] sm:$0xff]  }
 0x108   : > { %v707_v54 = vsub.f32 %v705_v50, %v706_v51  ;;  %v728_v56 = vmul.f32 %v712_v52, %v636_v62  ;;  %v729_v57 = vmul.f32 %v712_v52, %v637_v5  ;;  %v726_v59 = vmul.f32 %v712_v52, %v634_v55  ;;  %v2379_v50 = vld [vmem:[%s3401_s13] sm:$0xff]  }
 0x109   : > { %v727_v60 = vmul.f32 %v712_v52, %v635_v58  ;;  %v724_v63 = vmul.f32 %v712_v52, %v3485_v49  ;;  %v725_v0 = vmul.f32 %v712_v52, %v633_v53  ;;  %v722_v6 = vmul.f32 %v712_v52, %v3475_v41 }
 0x10a   : > { %v734_v61 = vrot.slane %v707_v54, %v3502_v46  ;;  %v723_v62 = vmul.f32 %v712_v52, %v3480_v45  ;;  %v720_v5 = vmul.f32 %v712_v52, %v3463_v30  ;;  %v721_v8 = vmul.f32 %v712_v52, %v3470_v37  ;;  %v2453_v46 = vld [vmem:[%s3401_s13 + $0x60] sm:$0xff]  }
 0x10b   : > { %v718_v9 = vmul.f32 %v712_v52, %v3455_v24  ;;  %v719_v12 = vmul.f32 %v712_v52, %v3460_v28  ;;  %v716_v13 = vmul.f32 %v712_v52, %v3443_v18  ;;  %v717_v15 = vmul.f32 %v712_v52, %v3445_v19 }
 0x10c   : > { %v3512_v1 = vadd.f32 %v734_v61, %v728_v56  ;;  %v3514_v2 = vadd.f32 %v734_v61, %v729_v57  ;;  %v3516_v3 = vadd.f32 %v734_v61, %v726_v59  ;;  %v3518_v4 = vadd.f32 %v734_v61, %v727_v60 }
 0x10d   : > { %v3526_v49 = vadd.f32 %v734_v61, %v724_v63  ;;  %v3528_v53 = vadd.f32 %v734_v61, %v725_v0  ;;  %v3533_v7 = vadd.f32 %v734_v61, %v722_v6  ;;  %v3535_v45 = vadd.f32 %v734_v61, %v723_v62  ;;  %v2444_v63 = vld [vmem:[%s3401_s13 + $0x18] sm:$0xff]   ;;  %v2443_v62 = vld [vmem:[%s3401_s13 + $0x10] sm:$0xff]  }
 0x10e   : > { %3905 = vst [vmem:[#allocation27_spill] sm:$0xff] %v3512_v1  ;;  %3906 = vst [vmem:[#allocation28_spill] sm:$0xff] %v3514_v2  ;;  %v791_v55 = vpack.c.bf16 %v3514_v2, %v3512_v1  ;;  %v790_v58 = vpack.c.bf16 %v3518_v4, %v3516_v3  ;;  %v3541_v11 = vadd.f32 %v734_v61, %v720_v5  ;;  %v2384_v51 = vunpack.c.l.bf16 %v2442_v48 }
 0x10f   : > { %3907 = vst [vmem:[#allocation29_spill] sm:$0xff] %v3516_v3  ;;  %3908 = vst [vmem:[#allocation30_spill] sm:$0xff] %v3518_v4  ;;  %v789_v41 = vpack.c.bf16 %v3528_v53, %v3526_v49  ;;  %v788_v10 = vpack.c.bf16 %v3535_v45, %v3533_v7  ;;  %v3543_v30 = vadd.f32 %v734_v61, %v721_v8  ;;  %v2380_v54 = vunpack.c.l.bf16 %v2379_v50 }
 0x110   : > { %3909 = vst [vmem:[#allocation31_spill] sm:$0xff] %v3528_v53  ;;  %2609 = vmatprep.subr.bf16.mxu0 %v791_v55  ;;  %v3549_v14 = vadd.f32 %v734_v61, %v718_v9  ;;  %v3551_v24 = vadd.f32 %v734_v61, %v719_v12  ;;  %v3554_v20 = vadd.f32 %v734_v61, %v716_v13  ;;  %v2385_v56 = vunpack.c.h.bf16 %v2442_v48  ;;  %v2802_v48 = vld [vmem:[%s3407_s16 + $0x70] ss:$8 sps:$4 sm:$0xff]  }
 0x111   : > { %2610 = vmatpush3.bf16.msra.mxu0 %v791_v55  ;;  %v787_v37 = vpack.c.bf16 %v3543_v30, %v3541_v11  ;;  %v3558_v21 = vadd.f32 %v734_v61, %v717_v15  ;;  %v714_v18 = vmul.f32 %v712_v52, %v3439_v16  ;;  %v715_v22 = vmul.f32 %v712_v52, %v3441_v17  ;;  %v2764_v16 = vld [vmem:[#allocation8 + $0x10] sm:$0xff]   ;;  %v2765_v17 = vld [vmem:[#allocation8 + $0x18] sm:$0xff]  }
 0x112   : > { %2611 = vmatprep.subr.bf16.mxu0 %v790_v58  ;;  %v786_v28 = vpack.c.bf16 %v3551_v24, %v3549_v14  ;;  %v2381_v60 = vunpack.c.h.bf16 %v2379_v50  ;;  %v2392_v8 = vunpack.c.l.bf16 %v2444_v63  ;;  %v2393_v15 = vunpack.c.h.bf16 %v2444_v63  ;;  %v2804_v50 = vld [vmem:[%s3407_s16 + $0x74] ss:$8 sps:$4 sm:$0xff]   ;;  %v2813_v63 = vld [vmem:[%s3407_s16 + $0x44] ss:$8 sps:$4 sm:$0xff]  }
 0x113   : > { %v785_v23 = vpack.c.bf16 %v3558_v21, %v3554_v20  ;;  %v3564_v25 = vadd.f32 %v734_v61, %v714_v18  ;;  %v3566_v19 = vadd.f32 %v734_v61, %v715_v22 }
 0x115   : > { %2612 = vmatpush3.bf16.msra.mxu0 %v790_v58  ;;  %v784_v26 = vpack.c.bf16 %v3566_v19, %v3564_v25 }
 0x116   : > { %2613 = vmatprep.subr.bf16.mxu0 %v789_v41 }
 0x119   : > { %2614 = vmatpush3.bf16.msra.mxu0 %v789_v41 }
 0x11a   : > { %2615 = vmatprep.subr.bf16.mxu0 %v788_v10 }
 0x11d   : > { %2616 = vmatpush3.bf16.msra.mxu0 %v788_v10  ;;  %v2388_v10 = vunpack.c.l.bf16 %v2443_v62 }
 0x11e   : > { %2617 = vmatprep.subr.bf16.mxu0 %v787_v37 }
 0x121   : > { %2618 = vmatpush3.bf16.msra.mxu0 %v787_v37 }
 0x122   : > { %2619 = vmatprep.subr.bf16.mxu0 %v786_v28 }
 0x125   : > { %2620 = vmatpush3.bf16.msra.mxu0 %v786_v28 }
 0x126   : > { %2621 = vmatprep.subr.bf16.mxu0 %v785_v23 }
 0x129   : > { %2622 = vmatpush3.bf16.msra.mxu0 %v785_v23  ;;  %v2389_v23 = vunpack.c.h.bf16 %v2443_v62  ;;  %v2811_v62 = vld [vmem:[%s3407_s16 + $0x40] ss:$8 sps:$4 sm:$0xff]  }
 0x12a   : > { %2623 = vmatprep.subr.bf16.mxu0 %v784_v26 }
 0x12d   : > { %2624 = vmatpush3.bf16.msra.mxu0 %v784_v26 }
 0x12e   : > { %1505 = vmatprep.subr.bf16.mxu0 %v2804_v50 }
 0x130   : > { %2626 = vmatmul.mubr.bf16.vlgmr.msra.gmra.mxu0 %v2763_v27 }
 0x131   : > { %2629 = vmatprep.mubr.bf16.mxu0 %v2764_v16  ;;  %1506 = vmatpush1.bf16.msra.mxu0 %v2802_v48 }
 0x138   : > { %2630 = vmatmul.mubr.bf16.gmra.mxu0 %v2765_v17 }
 0x139   : > { %2633 = vmatprep.mubr.bf16.mxu0 %v2766_v29 }
 0x140   : > { %2634 = vmatmul.mubr.bf16.gmra.mxu0 %v2767_v31 }
 0x141   : > { %2637 = vmatprep.mubr.bf16.mxu0 %v2768_v32 }
 0x148   : > { %2638 = vmatmul.mubr.bf16.gmra.mxu0 %v2769_v33 }
 0x149   : > { %2641 = vmatprep.mubr.bf16.mxu0 %v2770_v34 }
 0x150   : > { %2642 = vmatmul.mubr.bf16.gmra.mxu0 %v2771_v35 }
 0x151   : > { %2645 = vmatprep.mubr.bf16.mxu0 %v2772_v36 }
 0x158   : > { %2646 = vmatmul.mubr.bf16.gmra.mxu0 %v2773_v38 }
 0x159   : > { %2649 = vmatprep.mubr.bf16.mxu0 %v2774_v39 }
 0x160   : > { %2650 = vmatmul.mubr.bf16.gmra.mxu0 %v2775_v40 }
 0x161   : > { %2653 = vmatprep.mubr.bf16.mxu0 %v2776_v42 }
 0x168   : > { %2654 = vmatmul.mubr.bf16.gmra.mxu0 %v2777_v44 }
 0x1f0   : > { %v2627_v52 = vpop.f32.mrf.mxu0 }
 0x1f1   : > { %v995_v59 = vadd.f32 %v2627_v52, %v2384_v51  ;;  %v2807_v52 = vld [vmem:[%s3407_s16 + $0x64] ss:$8 sps:$4 sm:$0xff]  }
 0x1f2   : > { %v986_v57 = vpop.f32.mrf.mxu0  ;;  %1507 = vmatprep.subr.bf16.mxu0 %v2807_v52 }
 0x1f3   : > { %v987_v0 = vadd.f32 %v2380_v54, %v986_v57  ;;  %v1115_v58 = vmax.f32 %v995_v59, 0.0  ;;  %v2810_v57 = vld [vmem:[%s3407_s16 + $0x54] ss:$8 sps:$4 sm:$0xff]  }
 0x1f4   : > { %v2628_v61 = vpop.f32.mrf.mxu0 }
 0x1f5   : > { %v998_v6 = vadd.f32 %v2628_v61, %v2385_v56  ;;  %v1113_v12 = vmax.f32 %v987_v0, 0.0  ;;  %v2805_v56 = vld [vmem:[%s3407_s16 + $0x60] ss:$8 sps:$4 sm:$0xff]   ;;  %v2808_v61 = vld [vmem:[%s3407_s16 + $0x50] ss:$8 sps:$4 sm:$0xff]  }
 0x1f6   : > { %v989_v55 = vpop.f32.mrf.mxu0  ;;  %1508 = vmatpush1.bf16.msra.mxu0 %v2805_v56 }
 0x1f7   : > { %v1116_v5 = vmax.f32 %v998_v6, 0.0  ;;  %v990_v41 = vadd.f32 %v2381_v60, %v989_v55  ;;  %1509 = vmatprep.subr.bf16.mxu0 %v2810_v57  ;;  %v2816_v55 = vld [vmem:[%s3407_s16 + $0x34] ss:$8 sps:$4 sm:$0xff]   ;;  %v2454_v57 = vld [vmem:[%s3401_s13 + $0x68] sm:$0xff]  }
 0x1f8   : > { %v2631_v9 = vpop.f32.mrf.mxu0 }
 0x1f9   : > { %v3574_v13 = vpack.c.bf16 %v1116_v5, %v1115_v58  ;;  %v1114_v37 = vmax.f32 %v990_v41, 0.0  ;;  %v1011_v22 = vadd.f32 %v2631_v9, %v2392_v8  ;;  %v2814_v41 = vld [vmem:[%s3407_s16 + $0x30] ss:$8 sps:$4 sm:$0xff]   ;;  %v2819_v8 = vld [vmem:[%s3407_s16 + $0x24] ss:$8 sps:$4 sm:$0xff]  }
 0x1fa   : > { %v1002_v28 = vpop.f32.mrf.mxu0  ;;  %1510 = vmatpush1.bf16.msra.mxu0 %v2808_v61 }
 0x1fb   : > { %v3576_v18 = vpack.c.bf16 %v1114_v37, %v1113_v12  ;;  %v1003_v27 = vadd.f32 %v2388_v10, %v1002_v28  ;;  %v1119_v29 = vmax.f32 %v1011_v22, 0.0  ;;  %1511 = vmatprep.subr.bf16.mxu0 %v2813_v63  ;;  %v2817_v12 = vld [vmem:[%s3407_s16 + $0x20] ss:$8 sps:$4 sm:$0xff]   ;;  %v2822_v37 = vld [vmem:[%s3407_s16 + $0x14] ss:$8 sps:$4 sm:$0xff]   ;;  %v2433_v63 = vunpack.c.h.bf16 %v2454_v57 }
 0x1fc   : > { %v2632_v26 = vpop.f32.mrf.mxu0  ;;  %v2820_v22 = vld [vmem:[%s3407_s16 + $0x10] ss:$8 sps:$4 sm:$0xff]  }
 0x1fd   : > { %v1014_v16 = vadd.f32 %v2632_v26, %v2393_v15  ;;  %v1117_v34 = vmax.f32 %v1003_v27, 0.0  ;;  %v2456_v26 = vld [vmem:[%s3401_s13 + $0x78] sm:$0xff]  }
 0x1fe   : > { %v1005_v17 = vpop.f32.mrf.mxu0  ;;  %1512 = vmatpush1.bf16.msra.mxu0 %v2811_v62  ;;  %v2448_v27 = vld [vmem:[%s3401_s13 + $0x38] sm:$0xff]   ;;  %v2441_v50 = vunpack.c.h.bf16 %v2456_v26 }
 0x1ff   : > { %v1120_v31 = vmax.f32 %v1014_v16, 0.0  ;;  %v1006_v32 = vadd.f32 %v2389_v23, %v1005_v17  ;;  %1513 = vmatprep.subr.bf16.mxu0 %v2816_v55  ;;  %v2409_v16 = vunpack.c.h.bf16 %v2448_v27 }
 0x200   : > { %v3578_v33 = vpop.f32.mrf.mxu0 }
 0x201   : > { %v3580_v35 = vpack.c.bf16 %v1120_v31, %v1119_v29  ;;  %v1118_v36 = vmax.f32 %v1006_v32, 0.0  ;;  %v2455_v29 = vld [vmem:[%s3401_s13 + $0x70] sm:$0xff]   ;;  %v2440_v31 = vunpack.c.l.bf16 %v2456_v26  ;;  %v2408_v32 = vunpack.c.l.bf16 %v2448_v27 }
 0x202   : > { %v3582_v38 = vpop.f32.mrf.mxu0  ;;  %1514 = vmatpush1.bf16.msra.mxu0 %v2814_v41  ;;  %v2436_v48 = vunpack.c.l.bf16 %v2455_v29  ;;  %v2437_v55 = vunpack.c.h.bf16 %v2455_v29 }
 0x203   : > { %v3584_v39 = vpack.c.bf16 %v1118_v36, %v1117_v34  ;;  %1515 = vmatprep.subr.bf16.mxu0 %v2819_v8  ;;  %v2447_v36 = vld [vmem:[%s3401_s13 + $0x30] sm:$0xff]  }
 0x204   : > { %v3586_v40 = vpop.f32.mrf.mxu0  ;;  %v2405_v56 = vunpack.c.h.bf16 %v2447_v36  ;;  %v2404_v8 = vunpack.c.l.bf16 %v2447_v36  ;;  %v2428_v36 = vunpack.c.l.bf16 %v2453_v46 }
 0x206   : > { %v3588_v42 = vpop.f32.mrf.mxu0  ;;  %1516 = vmatpush1.bf16.msra.mxu0 %v2817_v12 }
 0x207   : > { %1517 = vmatprep.subr.bf16.mxu0 %v2822_v37  ;;  %v2446_v37 = vld [vmem:[%s3401_s13 + $0x28] sm:$0xff]  }
 0x208   : > { %v2639_v44 = vpop.f32.mrf.mxu0  ;;  %v2401_v2 = vunpack.c.h.bf16 %v2446_v37 }
 0x209   : > { %v1043_v41 = vadd.f32 %v2639_v44, %v2408_v32  ;;  %v2400_v44 = vunpack.c.l.bf16 %v2446_v37  ;;  %v2451_v37 = vld [vmem:[%s3401_s13 + $0x50] sm:$0xff]  }
 0x20a   : > { %v3590_v47 = vpop.f32.mrf.mxu0  ;;  %1518 = vmatpush1.bf16.msra.mxu0 %v2820_v22  ;;  %v2432_v22 = vunpack.c.l.bf16 %v2454_v57  ;;  %v2445_v57 = vld [vmem:[%s3401_s13 + $0x20] sm:$0xff]  }
 0x20b   : > { %v1127_v32 = vmax.f32 %v1043_v41, 0.0 }
 0x20c   : > { %v2640_v51 = vpop.f32.mrf.mxu0 }
 0x20d   : > { %v1046_v52 = vadd.f32 %v2640_v51, %v2409_v16  ;;  %v2429_v51 = vunpack.c.h.bf16 %v2453_v46  ;;  %v2396_v46 = vunpack.c.l.bf16 %v2445_v57 }
 0x20e   : > { %v3595_v54 = vpop.f32.mrf.mxu0 }
 0x20f   : > { %v1128_v1 = vmax.f32 %v1046_v52, 0.0  ;;  %v1038_v26 = vadd.f32 %v2405_v56, %v3595_v54  ;;  %v1030_v52 = vadd.f32 %v3586_v40, %v2401_v2  ;;  %v2397_v54 = vunpack.c.h.bf16 %v2445_v57 }
 0x210   : > { %v3599_v59 = vpop.f32.mrf.mxu0 }
 0x211   : > { %v1126_v56 = vmax.f32 %v1038_v26, 0.0  ;;  %v1124_v2 = vmax.f32 %v1030_v52, 0.0  ;;  %v1022_v40 = vadd.f32 %v2397_v54, %v3588_v42  ;;  %v1019_v26 = vadd.f32 %v2396_v46, %v3582_v38  ;;  %v2778_v46 = vld [vmem:[#allocation10] ss:$8 sps:$4 sm:$0xff]  }
 0x212   : > { %v3601_v60 = vpop.f32.mrf.mxu0 }
 0x213   : > { %v1122_v42 = vmax.f32 %v1022_v40, 0.0  ;;  %v2798_v40 = vld [vmem:[#allocation10 + $0x60] ss:$8 sps:$4 sm:$0xff]  }
 0x214   : > { %v3605_v0 = vpop.f32.mrf.mxu0 }
 0x216   : > { %v3607_v6 = vpop.f32.mrf.mxu0 }
 0x218   : > { %v3611_v58 = vpop.f32.mrf.mxu0 }
 0x21a   : > { %v3613_v5 = vpop.f32.mrf.mxu0 }
 0x21c   : > { %v3617_v9 = vpop.f32.mrf.mxu0 }
 0x21e   : > { %v3619_v10 = vpop.f32.mrf.mxu0 }
 0x220   : > { %v2651_v15 = vpop.f32.mrf.mxu0 }
 0x221   : > { %v1091_v53 = vadd.f32 %v2651_v15, %v2432_v22 }
 0x222   : > { %v3623_v28 = vpop.f32.mrf.mxu0 }
 0x224   : > { %v2652_v23 = vpop.f32.mrf.mxu0 }
 0x225   : > { %v1094_v4 = vadd.f32 %v2652_v23, %v2433_v63  ;;  %v1168_v23 = vpack.c.bf16 %v1128_v1, %v1127_v32 }
 0x226   : > { %v1085_v17 = vpop.f32.mrf.mxu0 }
 0x228   : > { %v2655_v34 = vpop.f32.mrf.mxu0 }
 0x229   : > { %v1107_v62 = vadd.f32 %v2655_v34, %v2440_v31  ;;  %v1035_v34 = vadd.f32 %v2404_v8, %v3590_v47  ;;  %v1027_v47 = vadd.f32 %v3578_v33, %v2400_v44  ;;  %v1139_v8 = vmax.f32 %v1091_v53, 0.0 }
 0x22a   : > { %v1098_v61 = vpop.f32.mrf.mxu0 }
 0x22b   : > { %v1099_v27 = vadd.f32 %v2436_v48, %v1098_v61  ;;  %v1143_v3 = vmax.f32 %v1107_v62, 0.0  ;;  %v1086_v62 = vadd.f32 %v2429_v51, %v1085_v17  ;;  %v1125_v41 = vmax.f32 %v1035_v34, 0.0 }
 0x22c   : > { %v2656_v12 = vpop.f32.mrf.mxu0  ;;  %v2421_v17 = vunpack.c.h.bf16 %v2451_v37  ;;  %v1123_v33 = vmax.f32 %v1027_v47, 0.0  ;;  %v2420_v51 = vunpack.c.l.bf16 %v2451_v37  ;;  %v1121_v34 = vmax.f32 %v1019_v26, 0.0  ;;  %v2801_v37 = vld [vmem:[#allocation10 + $0x70] ss:$8 sps:$4 sm:$0xff]  }
 0x22d   : > { %v1110_v43 = vadd.f32 %v2656_v12, %v2441_v50  ;;  %v1141_v48 = vmax.f32 %v1099_v27, 0.0  ;;  %v2452_v12 = vld [vmem:[%s3401_s13 + $0x58] sm:$0xff]   ;;  %v1167_v1 = vpack.c.bf16 %v1126_v56, %v1125_v41  ;;  %v1138_v27 = vmax.f32 %v1086_v62, 0.0  ;;  %v2784_v41 = vld [vmem:[#allocation10 + $0x24] ss:$8 sps:$4 sm:$0xff]   ;;  %v2828_v26 = vld [vmem:[%s3409_s24 + $0x70] sm:$0xff]  }
 0x22e   : > { %v1101_v16 = vpop.f32.mrf.mxu0  ;;  %v2425_v63 = vunpack.c.h.bf16 %v2452_v12  ;;  %v2424_v15 = vunpack.c.l.bf16 %v2452_v12  ;;  %v1067_v38 = vadd.f32 %v2420_v51, %v3613_v5  ;;  %v2830_v51 = vld [vmem:[%s3409_s24 + $0x68] sm:$0xff]  }
 0x22f   : > { %v1144_v31 = vmax.f32 %v1110_v43, 0.0  ;;  %v1102_v29 = vadd.f32 %v2437_v55, %v1101_v16  ;;  %v1140_v43 = vmax.f32 %v1094_v4, 0.0  ;;  %v1166_v16 = vpack.c.bf16 %v1124_v2, %v1123_v33  ;;  %v2796_v2 = vld [vmem:[#allocation10 + $0x64] ss:$8 sps:$4 sm:$0xff]   ;;  %v2827_v33 = vld [vmem:[%s3409_s24 + $0x38] sm:$0xff]  }
 0x230   : > { %v1078_v4 = vadd.f32 %v3617_v9, %v2425_v63  ;;  %v1075_v53 = vadd.f32 %v3611_v58, %v2424_v15  ;;  %v1070_v9 = vadd.f32 %v2421_v17, %v3619_v10  ;;  %v1165_v58 = vpack.c.bf16 %v1122_v42, %v1121_v34  ;;  %v2787_v15 = vld [vmem:[#allocation10 + $0x34] ss:$8 sps:$4 sm:$0xff]   ;;  %v2825_v17 = vld [vmem:[%s3407_s16 + $0x4] ss:$8 sps:$4 sm:$0xff]  }
 0x231   : > { %v1142_v50 = vmax.f32 %v1102_v29, 0.0  ;;  %v1176_v61 = vpack.c.bf16 %v1144_v31, %v1143_v3  ;;  %v1083_v3 = vadd.f32 %v2428_v36, %v3623_v28  ;;  %v1174_v22 = vpack.c.bf16 %v1140_v43, %v1139_v8  ;;  %v2450_v31 = vld [vmem:[%s3401_s13 + $0x48] sm:$0xff]   ;;  %1519 = vmatprep.subr.bf16.mxu0 %v2825_v17  ;;  %v2833_v42 = vld [vmem:[%s3409_s24 + $0x20] sm:$0xff]  }
 0x232   : > { %v2417_v29 = vunpack.c.h.bf16 %v2450_v31  ;;  %v1136_v44 = vmax.f32 %v1078_v4, 0.0  ;;  %v2416_v36 = vunpack.c.l.bf16 %v2450_v31  ;;  %v1135_v57 = vmax.f32 %v1075_v53, 0.0  ;;  %v2790_v8 = vld [vmem:[#allocation10 + $0x44] ss:$8 sps:$4 sm:$0xff]   ;;  %v2823_v4 = vld [vmem:[%s3407_s16] ss:$8 sps:$4 sm:$0xff]  }
 0x233   : > { %v1175_v55 = vpack.c.bf16 %v1142_v50, %v1141_v48  ;;  %2481 = vmatprep.subr.bf16.mxu1 %v1176_v61  ;;  %v1137_v28 = vmax.f32 %v1083_v3, 0.0  ;;  %v2449_v48 = vld [vmem:[%s3401_s13 + $0x40] sm:$0xff]   ;;  %v1134_v54 = vmax.f32 %v1070_v9, 0.0  ;;  %v1133_v10 = vmax.f32 %v1067_v38, 0.0  ;;  %v2793_v3 = vld [vmem:[#allocation10 + $0x54] ss:$8 sps:$4 sm:$0xff]   ;;  %1520 = vmatpush1.bf16.msra.mxu0 %v2823_v4 }
 0x234   : > { %2482 = vmatpush3.bf16.msra.mxu1 %v1168_v23  ;;  %v1062_v50 = vadd.f32 %v3605_v0, %v2417_v29  ;;  %v2413_v61 = vunpack.c.h.bf16 %v2449_v48  ;;  %v1172_v52 = vpack.c.bf16 %v1136_v44, %v1135_v57  ;;  %v1059_v56 = vadd.f32 %v3599_v59, %v2416_v36  ;;  %v2829_v53 = vld [vmem:[%s3409_s24 + $0x30] sm:$0xff]   ;;  %v2834_v31 = vld [vmem:[%s3409_s24 + $0x58] sm:$0xff]   ;;  %v2839_v34 = vld [vmem:[%s3409_s24 + $0x8] sm:$0xff]   ;;  %s1354_s13 = sld [smem:[#allocation3 + %s3192_s21]] }
 0x235   : > { %2483 = vmatprep.subr.bf16.mxu1 %v1175_v55  ;;  %v1173_v32 = vpack.c.bf16 %v1138_v27, %v1137_v28  ;;  %v2412_v12 = vunpack.c.l.bf16 %v2449_v48  ;;  %v1171_v43 = vpack.c.bf16 %v1134_v54, %v1133_v10  ;;  %v2826_v27 = vld [vmem:[%s3409_s24 + $0x78] sm:$0xff]   ;;  %v2831_v28 = vld [vmem:[%s3409_s24 + $0x28] sm:$0xff]   ;;  %v2836_v44 = vld [vmem:[%s3409_s24 + $0x50] sm:$0xff]  }
 0x236   : > { %v1132_v23 = vmax.f32 %v1062_v50, 0.0  ;;  %v1054_v63 = vadd.f32 %v2413_v61, %v3607_v6  ;;  %v1131_v5 = vmax.f32 %v1059_v56, 0.0  ;;  %v2781_v6 = vld [vmem:[#allocation10 + $0x14] ss:$8 sps:$4 sm:$0xff]  }
 0x237   : > { %v1051_v62 = vadd.f32 %v2412_v12, %v3601_v60  ;;  %v2786_v60 = vld [vmem:[#allocation10 + $0x20] ss:$8 sps:$4 sm:$0xff]   ;;  %v2835_v29 = vld [vmem:[%s3409_s24 + $0x18] sm:$0xff]   ;;  %v2837_v9 = vld [vmem:[%s3409_s24 + $0x10] sm:$0xff]  }
 0x238   : > { %2484 = vmatpush3.bf16.msra.mxu1 %v1167_v1  ;;  %v1170_v0 = vpack.c.bf16 %v1132_v23, %v1131_v5  ;;  %v1130_v55 = vmax.f32 %v1054_v63, 0.0  ;;  %v2799_v1 = vld [vmem:[#allocation10 + $0x74] ss:$8 sps:$4 sm:$0xff]  }
 0x239   : > { %2485 = vmatprep.subr.bf16.mxu1 %v1174_v22  ;;  %v1129_v47 = vmax.f32 %v1051_v62, 0.0  ;;  %v3108_v22 = vmov 0  }
 0x23a   : > { %1537 = vmatprep.mubr.bf16.mxu0 %v3108_v22  ;;  %s1355_s16 = sadd.f32 1.0, %s1354_s13 }
 0x23b   : > { %v1169_v59 = vpack.c.bf16 %v1130_v55, %v1129_v47 }
 0x23c   : > { %2486 = vmatpush3.bf16.msra.mxu1 %v1166_v16  ;;  %v2832_v16 = vld [vmem:[%s3409_s24 + $0x60] sm:$0xff]   ;;  %v3675_v38 = vstv %s1355_s16 }
 0x23d   : > { %2487 = vmatprep.subr.bf16.mxu1 %v1173_v32  ;;  %v2838_v32 = vld [vmem:[%s3409_s24 + $0x48] sm:$0xff]   ;;  %v1357_v50 = vmul.f32 %v3675_v38, %v3564_v25  ;;  %v1358_v61 = vmul.f32 %v3675_v38, %v3566_v19  ;;  %v1359_v62 = vmul.f32 %v3675_v38, %v3554_v20  ;;  %v1362_v20 = vmul.f32 %v3675_v38, %v3551_v24 }
 0x240   : > { %2488 = vmatpush3.bf16.msra.mxu1 %v1165_v58 }
 0x241   : > { %2489 = vmatprep.subr.bf16.mxu1 %v1172_v52 }
 0x244   : > { %2490 = vmatpush3.bf16.msra.mxu1 %v3580_v35  ;;  %v2783_v35 = vld [vmem:[#allocation10 + $0x10] ss:$8 sps:$4 sm:$0xff]  }
 0x245   : > { %2491 = vmatprep.subr.bf16.mxu1 %v1171_v43 }
 0x248   : > { %2492 = vmatpush3.bf16.msra.mxu1 %v3584_v39  ;;  %v2789_v39 = vld [vmem:[#allocation10 + $0x30] ss:$8 sps:$4 sm:$0xff]  }
 0x249   : > { %2493 = vmatprep.subr.bf16.mxu1 %v1170_v0  ;;  %v1360_v0 = vmul.f32 %v3675_v38, %v3558_v21 }
 0x24c   : > { %2494 = vmatpush3.bf16.msra.mxu1 %v3574_v13  ;;  %v2792_v13 = vld [vmem:[#allocation10 + $0x40] ss:$8 sps:$4 sm:$0xff]  }
 0x24d   : > { %2495 = vmatprep.subr.bf16.mxu1 %v1169_v59 }
 0x250   : > { %2496 = vmatpush3.bf16.msra.mxu1 %v3576_v18  ;;  %v2795_v18 = vld [vmem:[#allocation10 + $0x50] ss:$8 sps:$4 sm:$0xff]  }
 0x251   : > { %2545 = vmatprep.subr.bf16.mxu1 %v2826_v27 }
 0x253   : > { %1290 = vmatmul.mubr.bf16.vlgmr.msra.gmra.mxu1 %v2778_v46 }
 0x254   : > { %1297 = vmatprep.mubr.bf16.mxu1 %v2781_v6  ;;  %2546 = vmatpush3.bf16.msra.mxu1 %v2827_v33 }
 0x255   : > { %2547 = vmatprep.subr.bf16.mxu1 %v2828_v26 }
 0x258   : > { %2548 = vmatpush3.bf16.msra.mxu1 %v2829_v53 }
 0x259   : > { %2549 = vmatprep.subr.bf16.mxu1 %v2830_v51 }
 0x25b   : > { %1298 = vmatmul.mubr.bf16.gmra.mxu1 %v2783_v35 }
 0x25c   : > { %1305 = vmatprep.mubr.bf16.mxu1 %v2784_v41  ;;  %2550 = vmatpush3.bf16.msra.mxu1 %v2831_v28  ;;  %v1365_v28 = vmul.f32 %v3675_v38, %v3533_v7  ;;  %v3910_v7 = vld [vmem:[#allocation31_spill] sm:$0xff] }
 0x25d   : > { %2551 = vmatprep.subr.bf16.mxu1 %v2832_v16 }
 0x260   : > { %2552 = vmatpush3.bf16.msra.mxu1 %v2833_v42 }
 0x261   : > { %2553 = vmatprep.subr.bf16.mxu1 %v2834_v31 }
 0x263   : > { %1306 = vmatmul.mubr.bf16.gmra.mxu1 %v2786_v60  ;;  %v1361_v60 = vmul.f32 %v3675_v38, %v3549_v14  ;;  %v1364_v14 = vmul.f32 %v3675_v38, %v3543_v30 }
 0x264   : > { %1313 = vmatprep.mubr.bf16.mxu1 %v2787_v15  ;;  %2554 = vmatpush3.bf16.msra.mxu1 %v2835_v29 }
 0x265   : > { %2555 = vmatprep.subr.bf16.mxu1 %v2836_v44 }
 0x268   : > { %2556 = vmatpush3.bf16.msra.mxu1 %v2837_v9 }
 0x269   : > { %2557 = vmatprep.subr.bf16.mxu1 %v2838_v32 }
 0x26b   : > { %1314 = vmatmul.mubr.bf16.gmra.mxu1 %v2789_v39 }
 0x26c   : > { %1321 = vmatprep.mubr.bf16.mxu1 %v2790_v8  ;;  %2558 = vmatpush3.bf16.msra.mxu1 %v2839_v34 }
 0x273   : > { %1322 = vmatmul.mubr.bf16.gmra.mxu1 %v2792_v13 }
 0x274   : > { %1329 = vmatprep.mubr.bf16.mxu1 %v2793_v3 }
 0x27b   : > { %1330 = vmatmul.mubr.bf16.gmra.mxu1 %v2795_v18 }
 0x27c   : > { %1337 = vmatprep.mubr.bf16.mxu1 %v2796_v2 }
 0x283   : > { %1338 = vmatmul.mubr.bf16.gmra.mxu1 %v2798_v40 }
 0x284   : > { %1345 = vmatprep.mubr.bf16.mxu1 %v2799_v1  ;;  %v1363_v1 = vmul.f32 %v3675_v38, %v3541_v11  ;;  %v1366_v11 = vmul.f32 %v3675_v38, %v3535_v45 }
 0x28b   : > { %1346 = vmatmul.mubr.bf16.gmra.mxu1 %v2801_v37 }
 0x313   : > { %v2497_v36 = vpop.f32.mrf.mxu1 }
 0x315   : > { %v2498_v57 = vpop.f32.mrf.mxu1 }
 0x316   : > { %v2499_v48 = vadd.f32 %v2498_v57, %v2497_v36  ;;  %v1367_v36 = vmul.f32 %v3675_v38, %v3526_v49  ;;  %v1368_v57 = vmul.f32 %v3675_v38, %v3910_v7  ;;  %v3912_v49 = vld [vmem:[#allocation30_spill] sm:$0xff] }
 0x317   : > { %v2500_v58 = vpop.f32.mrf.mxu1 }
 0x318   : > { %v1373_v12 = vadd.f32 %v2499_v48, %v1357_v50 }
 0x319   : > { %v2501_v52 = vpop.f32.mrf.mxu1 }
 0x31a   : > { %v2502_v54 = vadd.f32 %v2501_v52, %v2500_v58 }
 0x31b   : > { %v2503_v56 = vpop.f32.mrf.mxu1 }
 0x31c   : > { %v1374_v10 = vadd.f32 %v2502_v54, %v1358_v61 }
 0x31d   : > { %v2504_v23 = vpop.f32.mrf.mxu1 }
 0x31e   : > { %v1389_v63 = vpack.c.bf16 %v1374_v10, %v1373_v12  ;;  %v2505_v5 = vadd.f32 %v2504_v23, %v2503_v56  ;;  %v3911_v10 = vld [vmem:[#allocation29_spill] sm:$0xff] }
 0x31f   : > { %v2506_v43 = vpop.f32.mrf.mxu1  ;;  %v1369_v23 = vmul.f32 %v3675_v38, %v3911_v10 }
 0x320   : > { %1538 = vmatmul.mubr.bf16.vlgmr.msra.gmra.mxu0 %v1389_v63  ;;  %v1375_v47 = vadd.f32 %v2505_v5, %v1359_v62  ;;  %v1370_v63 = vmul.f32 %v3675_v38, %v3912_v49 }
 0x321   : > { %v2507_v25 = vpop.f32.mrf.mxu1  ;;  %1547 = vmatprep.mubr.bf16.mxu0 %v3108_v22 }
 0x322   : > { %v2508_v19 = vadd.f32 %v2507_v25, %v2506_v43 }
 0x323   : > { %v2509_v55 = vpop.f32.mrf.mxu1 }
 0x324   : > { %v1376_v59 = vadd.f32 %v2508_v19, %v1360_v0 }
 0x325   : > { %v2510_v46 = vpop.f32.mrf.mxu1 }
 0x326   : > { %v1390_v6 = vpack.c.bf16 %v1376_v59, %v1375_v47  ;;  %v2511_v41 = vadd.f32 %v2510_v46, %v2509_v55  ;;  %v3913_v46 = vld [vmem:[#allocation27_spill] sm:$0xff] }
 0x327   : > { %v2512_v35 = vpop.f32.mrf.mxu1 }
 0x328   : > { %1548 = vmatmul.mubr.bf16.gmra.mxu0 %v1390_v6  ;;  %v1377_v8 = vadd.f32 %v2511_v41, %v1361_v60  ;;  %v1371_v6 = vmul.f32 %v3675_v38, %v3913_v46 }
 0x329   : > { %v2513_v15 = vpop.f32.mrf.mxu1  ;;  %1557 = vmatprep.mubr.bf16.mxu0 %v3108_v22 }
 0x32a   : > { %v2514_v21 = vadd.f32 %v2513_v15, %v2512_v35  ;;  %v3914_v35 = vld [vmem:[#allocation28_spill] sm:$0xff] }
 0x32b   : > { %v2515_v39 = vpop.f32.mrf.mxu1  ;;  %v1372_v41 = vmul.f32 %v3675_v38, %v3914_v35 }
 0x32c   : > { %v1378_v13 = vadd.f32 %v2514_v21, %v1362_v20 }
 0x32d   : > { %v2516_v3 = vpop.f32.mrf.mxu1 }
 0x32e   : > { %v1391_v18 = vpack.c.bf16 %v1378_v13, %v1377_v8  ;;  %v2517_v40 = vadd.f32 %v2516_v3, %v2515_v39  ;;  %v2840_v8 = vld [vmem:[%s3409_s24 + $0x40] sm:$0xff]  }
 0x32f   : > { %v2518_v2 = vpop.f32.mrf.mxu1  ;;  %v2841_v13 = vld [vmem:[%s3409_s24] sm:$0xff]   ;;  %2559 = vmatprep.subr.bf16.mxu1 %v2840_v8 }
 0x330   : > { %1558 = vmatmul.mubr.bf16.gmra.mxu0 %v1391_v18  ;;  %v1379_v17 = vadd.f32 %v2517_v40, %v1363_v1  ;;  %2560 = vmatpush3.bf16.msra.mxu1 %v2841_v13  ;;  %v3915_v3 = vld [vmem:[#allocation25_spill] sm:$0xff] }
 0x331   : > { %v2519_v37 = vpop.f32.mrf.mxu1  ;;  %1567 = vmatprep.mubr.bf16.mxu0 %v3108_v22  ;;  %v1421_v18 = vsub.s32 1, %v3915_v3 }
 0x332   : > { %v2520_v24 = vadd.f32 %v2519_v37, %v2518_v2  ;;  %v1413_v2 = vld [vmem:[%s3435_s14] sm:$0x3] }
 0x333   : > { %v2521_v4 = vpop.f32.mrf.mxu1  ;;  %v3720_v1 = vrot.slane %v1413_v2, %v1421_v18 }
 0x334   : > { %v1380_v27 = vadd.f32 %v2520_v24, %v1364_v14  ;;  %v3916_v14 = vld [vmem:[#allocation26_spill] sm:$0xff] }
 0x335   : > { %v2522_v33 = vpop.f32.mrf.mxu1  ;;  %v3723_v38 = vrot.slane %v1413_v2, %v3916_v14 }
 0x336   : > { %v1392_v26 = vpack.c.bf16 %v1380_v27, %v1379_v17  ;;  %v2523_v51 = vadd.f32 %v2522_v33, %v2521_v4 }
 0x337   : > { %v2524_v53 = vpop.f32.mrf.mxu1 }
 0x338   : > { %1568 = vmatmul.mubr.bf16.gmra.mxu0 %v1392_v26  ;;  %v1381_v31 = vadd.f32 %v2523_v51, %v1365_v28 }
 0x339   : > { %v2525_v16 = vpop.f32.mrf.mxu1  ;;  %1577 = vmatprep.mubr.bf16.mxu0 %v3108_v22 }
 0x33a   : > { %v2526_v30 = vadd.f32 %v2525_v16, %v2524_v53 }
 0x33b   : > { %v2527_v42 = vpop.f32.mrf.mxu1 }
 0x33c   : > { %v1382_v29 = vadd.f32 %v2526_v30, %v1366_v11 }
 0x33d   : > { %v2528_v44 = vpop.f32.mrf.mxu1 }
 0x33e   : > { %v1393_v9 = vpack.c.bf16 %v1382_v29, %v1381_v31  ;;  %v2529_v34 = vadd.f32 %v2528_v44, %v2527_v42 }
 0x33f   : > { %v2530_v32 = vpop.f32.mrf.mxu1 }
 0x340   : > { %1578 = vmatmul.mubr.bf16.gmra.mxu0 %v1393_v9  ;;  %v1383_v50 = vadd.f32 %v2529_v34, %v1367_v36 }
 0x341   : > { %v2531_v58 = vpop.f32.mrf.mxu1  ;;  %1587 = vmatprep.mubr.bf16.mxu0 %v3108_v22 }
 0x342   : > { %v2532_v45 = vadd.f32 %v2531_v58, %v2530_v32 }
 0x343   : > { %v2533_v48 = vpop.f32.mrf.mxu1 }
 0x344   : > { %v1384_v61 = vadd.f32 %v2532_v45, %v1368_v57 }
 0x345   : > { %v2534_v52 = vpop.f32.mrf.mxu1 }
 0x346   : > { %v1394_v54 = vpack.c.bf16 %v1384_v61, %v1383_v50  ;;  %v2535_v12 = vadd.f32 %v2534_v52, %v2533_v48 }
 0x347   : > { %v2536_v56 = vpop.f32.mrf.mxu1 }
 0x348   : > { %1588 = vmatmul.mubr.bf16.gmra.mxu0 %v1394_v54  ;;  %v1385_v0 = vadd.f32 %v2535_v12, %v1369_v23 }
 0x349   : > { %v2537_v43 = vpop.f32.mrf.mxu1  ;;  %1597 = vmatprep.mubr.bf16.mxu0 %v3108_v22 }
 0x34a   : > { %v2538_v5 = vadd.f32 %v2537_v43, %v2536_v56 }
 0x34b   : > { %v2539_v62 = vpop.f32.mrf.mxu1 }
 0x34c   : > { %v1386_v25 = vadd.f32 %v2538_v5, %v1370_v63 }
 0x34d   : > { %v2540_v19 = vpop.f32.mrf.mxu1 }
 0x34e   : > { %v1395_v55 = vpack.c.bf16 %v1386_v25, %v1385_v0  ;;  %v2541_v59 = vadd.f32 %v2540_v19, %v2539_v62 }
 0x34f   : > { %v2542_v47 = vpop.f32.mrf.mxu1 }
 0x350   : > { %1598 = vmatmul.mubr.bf16.gmra.mxu0 %v1395_v55  ;;  %v1387_v15 = vadd.f32 %v2541_v59, %v1371_v6 }
 0x351   : > { %v2543_v60 = vpop.f32.mrf.mxu1  ;;  %1607 = vmatprep.mubr.bf16.mxu0 %v3108_v22 }
 0x352   : > { %v2544_v20 = vadd.f32 %v2543_v60, %v2542_v47 }
 0x354   : > { %v1388_v21 = vadd.f32 %v2544_v20, %v1372_v41 }
 0x356   : > { %v1396_v39 = vpack.c.bf16 %v1388_v21, %v1387_v15 }
 0x358   : > { %1608 = vmatmul.mubr.bf16.gmra.mxu0 %v1396_v39 }
 0x3e0   : > { %v1539_v40 = vpop.f32.mrf.mxu0 }
 0x3e1   : > { %v1540_v17 = vadd.f32 %v1539_v40, %v3723_v38 }
 0x3e2   : > { %v1541_v37 = vpop.f32.mrf.mxu0 }
 0x3e3   : > { %v1542_v24 = vadd.f32 %v1541_v37, %v3720_v1  ;;  %v1618_v11 = vmax.f32 %v1540_v17, 0.0 }
 0x3e4   : > { %v1543_v22 = vpop.f32.mrf.mxu0 }
 0x3e5   : > { %v1544_v4 = vadd.f32 %v1543_v22, %v3723_v38  ;;  %v1619_v51 = vmax.f32 %v1542_v24, 0.0 }
 0x3e6   : > { %v1545_v27 = vpop.f32.mrf.mxu0 }
 0x3e7   : > { %v1546_v33 = vadd.f32 %v1545_v27, %v3720_v1  ;;  %v1620_v26 = vmax.f32 %v1544_v4, 0.0 }
 0x3e8   : > { %v1549_v53 = vpop.f32.mrf.mxu0 }
 0x3e9   : > { %v1621_v28 = vmax.f32 %v1546_v33, 0.0  ;;  %v1650_v42 = vpack.c.bf16 %v1620_v26, %v1618_v11  ;;  %v1550_v9 = vadd.f32 %v1549_v53, %v3723_v38 }
 0x3ea   : > { %v1551_v16 = vpop.f32.mrf.mxu0 }
 0x3eb   : > { %v1651_v30 = vpack.c.bf16 %v1621_v28, %v1619_v51  ;;  %v1552_v29 = vadd.f32 %v1551_v16, %v3720_v1  ;;  %v1622_v45 = vmax.f32 %v1550_v9, 0.0 }
 0x3ec   : > { %v1553_v31 = vpop.f32.mrf.mxu0 }
 0x3ed   : > { %v1554_v44 = vadd.f32 %v1553_v31, %v3723_v38  ;;  %1833 = vmatprep.mubr.bf16.mxu1 %v1651_v30  ;;  %v1623_v57 = vmax.f32 %v1552_v29, 0.0 }
 0x3ee   : > { %v1555_v32 = vpop.f32.mrf.mxu0  ;;  %1834 = vmatmul.mubr.bf16.vlgmr.msra.gmra.mxu1 %v1650_v42 }
 0x3ef   : > { %v1556_v34 = vadd.f32 %v1555_v32, %v3720_v1  ;;  %v1624_v36 = vmax.f32 %v1554_v44, 0.0 }
 0x3f0   : > { %v1559_v7 = vpop.f32.mrf.mxu0 }
 0x3f1   : > { %v1625_v58 = vmax.f32 %v1556_v34, 0.0  ;;  %v1652_v61 = vpack.c.bf16 %v1624_v36, %v1622_v45  ;;  %v1560_v12 = vadd.f32 %v1559_v7, %v3723_v38 }
 0x3f2   : > { %v1561_v48 = vpop.f32.mrf.mxu0 }
 0x3f3   : > { %v1653_v50 = vpack.c.bf16 %v1625_v58, %v1623_v57  ;;  %v1562_v54 = vadd.f32 %v1561_v48, %v3720_v1  ;;  %v1626_v62 = vmax.f32 %v1560_v12, 0.0 }
 0x3f4   : > { %v1563_v52 = vpop.f32.mrf.mxu0 }
 0x3f5   : > { %v1564_v56 = vadd.f32 %v1563_v52, %v3723_v38  ;;  %1841 = vmatprep.mubr.bf16.mxu1 %v1653_v50  ;;  %v1627_v43 = vmax.f32 %v1562_v54, 0.0 }
 0x3f6   : > { %v1565_v10 = vpop.f32.mrf.mxu0  ;;  %1842 = vmatmul.mubr.bf16.gmra.mxu1 %v1652_v61 }
 0x3f7   : > { %v1566_v23 = vadd.f32 %v1565_v10, %v3720_v1  ;;  %v1628_v49 = vmax.f32 %v1564_v56, 0.0 }
 0x3f8   : > { %v1569_v63 = vpop.f32.mrf.mxu0 }
 0x3f9   : > { %v1629_v5 = vmax.f32 %v1566_v23, 0.0  ;;  %v1654_v19 = vpack.c.bf16 %v1628_v49, %v1626_v62  ;;  %v1570_v46 = vadd.f32 %v1569_v63, %v3723_v38 }
 0x3fa   : > { %v1571_v0 = vpop.f32.mrf.mxu0 }
 0x3fb   : > { %v1655_v25 = vpack.c.bf16 %v1629_v5, %v1627_v43  ;;  %v1572_v47 = vadd.f32 %v1571_v0, %v3720_v1  ;;  %v1630_v21 = vmax.f32 %v1570_v46, 0.0 }
 0x3fc   : > { %v1573_v55 = vpop.f32.mrf.mxu0 }
 0x3fd   : > { %v1574_v59 = vadd.f32 %v1573_v55, %v3723_v38  ;;  %1849 = vmatprep.mubr.bf16.mxu1 %v1655_v25  ;;  %v1631_v20 = vmax.f32 %v1572_v47, 0.0 }
 0x3fe   : > { %v1575_v6 = vpop.f32.mrf.mxu0  ;;  %1850 = vmatmul.mubr.bf16.gmra.mxu1 %v1654_v19 }
 0x3ff   : > { %v1576_v35 = vadd.f32 %v1575_v6, %v3720_v1  ;;  %v1632_v41 = vmax.f32 %v1574_v59, 0.0 }
 0x400   : > { %v1579_v60 = vpop.f32.mrf.mxu0 }
 0x401   : > { %v1633_v15 = vmax.f32 %v1576_v35, 0.0  ;;  %v1656_v13 = vpack.c.bf16 %v1632_v41, %v1630_v21  ;;  %v1580_v40 = vadd.f32 %v1579_v60, %v3723_v38  ;;  %v3762_v60 = vld [vmem:[%s584_s29] ss:$0 sm:$0xff] }
 0x402   : > { %v1581_v39 = vpop.f32.mrf.mxu0 }
 0x403   : > { %v1657_v8 = vpack.c.bf16 %v1633_v15, %v1631_v20  ;;  %v1582_v18 = vadd.f32 %v1581_v39, %v3720_v1  ;;  %v1634_v27 = vmax.f32 %v1580_v40, 0.0 }
 0x404   : > { %v1583_v3 = vpop.f32.mrf.mxu0 }
 0x405   : > { %v1584_v2 = vadd.f32 %v1583_v3, %v3723_v38  ;;  %1857 = vmatprep.mubr.bf16.mxu1 %v1657_v8  ;;  %v1635_v4 = vmax.f32 %v1582_v18, 0.0 }
 0x406   : > { %v1585_v14 = vpop.f32.mrf.mxu0  ;;  %1858 = vmatmul.mubr.bf16.gmra.mxu1 %v1656_v13 }
 0x407   : > { %v1586_v37 = vadd.f32 %v1585_v14, %v3720_v1  ;;  %v1636_v22 = vmax.f32 %v1584_v2, 0.0 }
 0x408   : > { %v1589_v24 = vpop.f32.mrf.mxu0 }
 0x409   : > { %v1637_v17 = vmax.f32 %v1586_v37, 0.0  ;;  %v1658_v53 = vpack.c.bf16 %v1636_v22, %v1634_v27  ;;  %v1590_v16 = vadd.f32 %v1589_v24, %v3723_v38 }
 0x40a   : > { %v1591_v33 = vpop.f32.mrf.mxu0 }
 0x40b   : > { %v1659_v26 = vpack.c.bf16 %v1637_v17, %v1635_v4  ;;  %v1592_v28 = vadd.f32 %v1591_v33, %v3720_v1  ;;  %v1638_v32 = vmax.f32 %v1590_v16, 0.0 }
 0x40c   : > { %v1593_v51 = vpop.f32.mrf.mxu0 }
 0x40d   : > { %v1594_v11 = vadd.f32 %v1593_v51, %v3723_v38  ;;  %1865 = vmatprep.mubr.bf16.mxu1 %v1659_v26  ;;  %v1639_v44 = vmax.f32 %v1592_v28, 0.0 }
 0x40e   : > { %v1595_v30 = vpop.f32.mrf.mxu0  ;;  %1866 = vmatmul.mubr.bf16.gmra.mxu1 %v1658_v53 }
 0x40f   : > { %v1596_v42 = vadd.f32 %v1595_v30, %v3720_v1  ;;  %v1640_v31 = vmax.f32 %v1594_v11, 0.0 }
 0x410   : > { %v1599_v29 = vpop.f32.mrf.mxu0 }
 0x411   : > { %v1641_v9 = vmax.f32 %v1596_v42, 0.0  ;;  %v1660_v7 = vpack.c.bf16 %v1640_v31, %v1638_v32  ;;  %v1600_v48 = vadd.f32 %v1599_v29, %v3723_v38 }
 0x412   : > { %v1601_v34 = vpop.f32.mrf.mxu0 }
 0x413   : > { %v1661_v36 = vpack.c.bf16 %v1641_v9, %v1639_v44  ;;  %v1602_v58 = vadd.f32 %v1601_v34, %v3720_v1  ;;  %v1642_v10 = vmax.f32 %v1600_v48, 0.0 }
 0x414   : > { %v1603_v57 = vpop.f32.mrf.mxu0 }
 0x415   : > { %v1604_v45 = vadd.f32 %v1603_v57, %v3723_v38  ;;  %1873 = vmatprep.mubr.bf16.mxu1 %v1661_v36  ;;  %v1643_v56 = vmax.f32 %v1602_v58, 0.0 }
 0x416   : > { %v1605_v50 = vpop.f32.mrf.mxu0  ;;  %1874 = vmatmul.mubr.bf16.gmra.mxu1 %v1660_v7 }
 0x417   : > { %v1606_v61 = vadd.f32 %v1605_v50, %v3720_v1  ;;  %v1644_v52 = vmax.f32 %v1604_v45, 0.0 }
 0x418   : > { %v1609_v54 = vpop.f32.mrf.mxu0 }
 0x419   : > { %v1645_v12 = vmax.f32 %v1606_v61, 0.0  ;;  %v1662_v63 = vpack.c.bf16 %v1644_v52, %v1642_v10  ;;  %v1610_v0 = vadd.f32 %v1609_v54, %v3723_v38 }
 0x41a   : > { %v1611_v23 = vpop.f32.mrf.mxu0 }
 0x41b   : > { %v1663_v49 = vpack.c.bf16 %v1645_v12, %v1643_v56  ;;  %v1612_v5 = vadd.f32 %v1611_v23, %v3720_v1  ;;  %v1646_v46 = vmax.f32 %v1610_v0, 0.0 }
 0x41c   : > { %v1613_v43 = vpop.f32.mrf.mxu0 }
 0x41d   : > { %v1614_v62 = vadd.f32 %v1613_v43, %v3723_v38  ;;  %1881 = vmatprep.mubr.bf16.mxu1 %v1663_v49  ;;  %v1647_v47 = vmax.f32 %v1612_v5, 0.0 }
 0x41e   : > { %v1615_v25 = vpop.f32.mrf.mxu0  ;;  %1882 = vmatmul.mubr.bf16.gmra.mxu1 %v1662_v63 }
 0x41f   : > { %v1616_v19 = vadd.f32 %v1615_v25, %v3720_v1  ;;  %v1648_v55 = vmax.f32 %v1614_v62, 0.0 }
 0x421   : > { %v1649_v59 = vmax.f32 %v1616_v19, 0.0  ;;  %v1664_v35 = vpack.c.bf16 %v1648_v55, %v1646_v46 }
 0x423   : > { %v1665_v6 = vpack.c.bf16 %v1649_v59, %v1647_v47 }
 0x425   : > { %1889 = vmatprep.mubr.bf16.mxu1 %v1665_v6 }
 0x426   : > { %1890 = vmatmul.mubr.bf16.gmra.mxu1 %v1664_v35 }
 0x4ae   : > { %v2561_v41 = vpop.f32.mrf.mxu1 }
 0x4b0   : > { %v2562_v38 = vpop.f32.mrf.mxu1 }
 0x4b1   : > { %v2563_v20 = vadd.f32 %v2562_v38, %v2561_v41 }
 0x4b2   : > { %v2564_v15 = vpop.f32.mrf.mxu1 }
 0x4b3   : > { %v3765_v1 = vadd.f32 %v2563_v20, %v3762_v60 }
 0x4b4   : > { %v2565_v21 = vpop.f32.mrf.mxu1 }
 0x4b5   : > { %1898 = vst [vmem:[#allocation2 + $0x30] sm:$0xff] %v3765_v1  ;;  %v2566_v39 = vadd.f32 %v2565_v21, %v2564_v15 }
 0x4b6   : > { %v2567_v8 = vpop.f32.mrf.mxu1 }
 0x4b7   : > { %v3769_v13 = vadd.f32 %v2566_v39, %v3762_v60 }
 0x4b8   : > { %v2568_v3 = vpop.f32.mrf.mxu1 }
 0x4b9   : > { %1899 = vst [vmem:[#allocation2] sm:$0xff] %v3769_v13  ;;  %v2569_v18 = vadd.f32 %v2568_v3, %v2567_v8 }
 0x4ba   : > { %v2570_v2 = vpop.f32.mrf.mxu1 }
 0x4bb   : > { %v3773_v40 = vadd.f32 %v2569_v18, %v3762_v60 }
 0x4bc   : > { %v2571_v14 = vpop.f32.mrf.mxu1 }
 0x4bd   : > { %1900 = vst [vmem:[#allocation2 + $0x58] sm:$0xff] %v3773_v40  ;;  %v2572_v37 = vadd.f32 %v2571_v14, %v2570_v2 }
 0x4be   : > { %v2573_v22 = vpop.f32.mrf.mxu1 }
 0x4bf   : > { %v3777_v24 = vadd.f32 %v2572_v37, %v3762_v60 }
 0x4c0   : > { %v2574_v4 = vpop.f32.mrf.mxu1 }
 0x4c1   : > { %1901 = vst [vmem:[#allocation2 + $0x18] sm:$0xff] %v3777_v24  ;;  %v2575_v17 = vadd.f32 %v2574_v4, %v2573_v22 }
 0x4c2   : > { %v2576_v27 = vpop.f32.mrf.mxu1 }
 0x4c3   : > { %v3781_v33 = vadd.f32 %v2575_v17, %v3762_v60 }
 0x4c4   : > { %v2577_v26 = vpop.f32.mrf.mxu1 }
 0x4c5   : > { %1902 = vst [vmem:[#allocation2 + $0x50] sm:$0xff] %v3781_v33  ;;  %v2578_v53 = vadd.f32 %v2577_v26, %v2576_v27 }
 0x4c6   : > { %v2579_v51 = vpop.f32.mrf.mxu1 }
 0x4c7   : > { %v3785_v28 = vadd.f32 %v2578_v53, %v3762_v60 }
 0x4c8   : > { %v2580_v11 = vpop.f32.mrf.mxu1 }
 0x4c9   : > { %1903 = vst [vmem:[#allocation2 + $0x68] sm:$0xff] %v3785_v28  ;;  %v2581_v16 = vadd.f32 %v2580_v11, %v2579_v51 }
 0x4ca   : > { %v2582_v30 = vpop.f32.mrf.mxu1 }
 0x4cb   : > { %v3789_v42 = vadd.f32 %v2581_v16, %v3762_v60 }
 0x4cc   : > { %v2583_v31 = vpop.f32.mrf.mxu1 }
 0x4cd   : > { %1904 = vst [vmem:[#allocation2 + $0x8] sm:$0xff] %v3789_v42  ;;  %v2584_v29 = vadd.f32 %v2583_v31, %v2582_v30 }
 0x4ce   : > { %v2585_v44 = vpop.f32.mrf.mxu1 }
 0x4cf   : > { %v1863_v9 = vadd.f32 %v2584_v29, %v3762_v60 }
 0x4d0   : > { %v2586_v32 = vpop.f32.mrf.mxu1 }
 0x4d1   : > { %1905 = vst [vmem:[#allocation2 + $0x48] sm:$0xff] %v1863_v9  ;;  %v2587_v34 = vadd.f32 %v2586_v32, %v2585_v44 }
 0x4d2   : > { %v2588_v36 = vpop.f32.mrf.mxu1 }
 0x4d3   : > { %v1868_v7 = vadd.f32 %v2587_v34, %v3762_v60 }
 0x4d4   : > { %v2589_v57 = vpop.f32.mrf.mxu1 }
 0x4d5   : > { %1906 = vst [vmem:[#allocation2 + $0x40] sm:$0xff] %v1868_v7  ;;  %v2590_v58 = vadd.f32 %v2589_v57, %v2588_v36 }
 0x4d6   : > { %v2591_v45 = vpop.f32.mrf.mxu1 }
 0x4d7   : > { %v1871_v48 = vadd.f32 %v2590_v58, %v3762_v60 }
 0x4d8   : > { %v2592_v50 = vpop.f32.mrf.mxu1 }
 0x4d9   : > { %1907 = vst [vmem:[#allocation2 + $0x20] sm:$0xff] %v1871_v48  ;;  %v2593_v61 = vadd.f32 %v2592_v50, %v2591_v45 }
 0x4da   : > { %v2594_v52 = vpop.f32.mrf.mxu1 }
 0x4db   : > { %v1876_v54 = vadd.f32 %v2593_v61, %v3762_v60 }
 0x4dc   : > { %v2595_v56 = vpop.f32.mrf.mxu1 }
 0x4dd   : > { %1908 = vst [vmem:[#allocation2 + $0x10] sm:$0xff] %v1876_v54  ;;  %v2596_v12 = vadd.f32 %v2595_v56, %v2594_v52 }
 0x4de   : > { %v2597_v10 = vpop.f32.mrf.mxu1 }
 0x4df   : > { %v1879_v23 = vadd.f32 %v2596_v12, %v3762_v60 }
 0x4e0   : > { %v2598_v49 = vpop.f32.mrf.mxu1 }
 0x4e1   : > { %1909 = vst [vmem:[#allocation2 + $0x38] sm:$0xff] %v1879_v23  ;;  %v2599_v63 = vadd.f32 %v2598_v49, %v2597_v10 }
 0x4e2   : > { %v2600_v43 = vpop.f32.mrf.mxu1 }
 0x4e3   : > { %v1884_v5 = vadd.f32 %v2599_v63, %v3762_v60 }
 0x4e4   : > { %v2601_v62 = vpop.f32.mrf.mxu1 }
 0x4e5   : > { %1910 = vst [vmem:[#allocation2 + $0x60] sm:$0xff] %v1884_v5  ;;  %v2602_v0 = vadd.f32 %v2601_v62, %v2600_v43 }
 0x4e6   : > { %v2603_v25 = vpop.f32.mrf.mxu1 }
 0x4e7   : > { %v1887_v19 = vadd.f32 %v2602_v0, %v3762_v60 }
 0x4e8   : > { %v2604_v55 = vpop.f32.mrf.mxu1 }
 0x4e9   : > { %1911 = vst [vmem:[#allocation2 + $0x70] sm:$0xff] %v1887_v19  ;;  %v2605_v47 = vadd.f32 %v2604_v55, %v2603_v25 }
 0x4ea   : > { %v2606_v59 = vpop.f32.mrf.mxu1 }
 0x4eb   : > { %v1892_v46 = vadd.f32 %v2605_v47, %v3762_v60 }
 0x4ec   : > { %v2607_v6 = vpop.f32.mrf.mxu1 }
 0x4ed   : > { %1912 = vst [vmem:[#allocation2 + $0x78] sm:$0xff] %v1892_v46  ;;  %v2608_v35 = vadd.f32 %v2607_v6, %v2606_v59  ;;  %1917 = sbr.rel (%p2370_p10) target bundleno = 1276 (0x4fc), region = 100 }
 0x4ef   : > { %v1895_v41 = vadd.f32 %v2608_v35, %v3762_v60 }
 0x4f1   : > { %1913 = vst [vmem:[#allocation2 + $0x28] sm:$0xff] %v1895_v41 }
 0x4f2   : > { %v1918_v38 = vmax.f32 %v3765_v1, 0.0  ;;  %v1919_v20 = vmax.f32 %v3769_v13, 0.0  ;;  %v1920_v15 = vmax.f32 %v3773_v40, 0.0  ;;  %v1921_v21 = vmax.f32 %v3777_v24, 0.0 }
 0x4f3   : > { %v1922_v39 = vmax.f32 %v3781_v33, 0.0  ;;  %v1923_v8 = vmax.f32 %v3785_v28, 0.0  ;;  %v1924_v60 = vmax.f32 %v3789_v42, 0.0  ;;  %v1925_v3 = vmax.f32 %v1863_v9, 0.0 }
 0x4f4   : > { %1934 = vst [vmem:[#allocation2 + $0x30] sm:$0xff] %v1918_v38  ;;  %1935 = vst [vmem:[#allocation2] sm:$0xff] %v1919_v20  ;;  %v1926_v18 = vmax.f32 %v1868_v7, 0.0  ;;  %v1927_v2 = vmax.f32 %v1871_v48, 0.0  ;;  %v1928_v1 = vmax.f32 %v1876_v54, 0.0  ;;  %v1929_v14 = vmax.f32 %v1879_v23, 0.0 }
 0x4f5   : > { %1936 = vst [vmem:[#allocation2 + $0x58] sm:$0xff] %v1920_v15  ;;  %1937 = vst [vmem:[#allocation2 + $0x18] sm:$0xff] %v1921_v21  ;;  %v1930_v13 = vmax.f32 %v1884_v5, 0.0  ;;  %v1931_v40 = vmax.f32 %v1887_v19, 0.0  ;;  %v1932_v37 = vmax.f32 %v1892_v46, 0.0  ;;  %v1933_v22 = vmax.f32 %v1895_v41, 0.0 }
 0x4f6   : > { %1938 = vst [vmem:[#allocation2 + $0x50] sm:$0xff] %v1922_v39  ;;  %1939 = vst [vmem:[#allocation2 + $0x68] sm:$0xff] %v1923_v8 }
 0x4f7   : > { %1940 = vst [vmem:[#allocation2 + $0x8] sm:$0xff] %v1924_v60  ;;  %1941 = vst [vmem:[#allocation2 + $0x48] sm:$0xff] %v1925_v3 }
 0x4f8   : > { %1942 = vst [vmem:[#allocation2 + $0x40] sm:$0xff] %v1926_v18  ;;  %1943 = vst [vmem:[#allocation2 + $0x20] sm:$0xff] %v1927_v2 }
 0x4f9   : > { %1944 = vst [vmem:[#allocation2 + $0x10] sm:$0xff] %v1928_v1  ;;  %1945 = vst [vmem:[#allocation2 + $0x38] sm:$0xff] %v1929_v14 }
 0x4fa   : > { %1946 = vst [vmem:[#allocation2 + $0x60] sm:$0xff] %v1930_v13  ;;  %1947 = vst [vmem:[#allocation2 + $0x70] sm:$0xff] %v1931_v40 }
 0x4fb   : > { %1948 = vst [vmem:[#allocation2 + $0x78] sm:$0xff] %v1932_v37  ;;  %1949 = vst [vmem:[#allocation2 + $0x28] sm:$0xff] %v1933_v22 }
 0x4fc PF: > { %v1983_v24 = vld [vmem:[#allocation2 + $0x30] sm:$0xff]  ;;  %v1984_v4 = vld [vmem:[#allocation2] sm:$0xff]  ;;  %v1985_v17 = vld [vmem:[#allocation2 + $0x58] sm:$0xff]  ;;  %v3109_v33 = vmov 0.0   ;;  %s3110_s26 = smov [#allocation16]  }
 0x4fd   : > { %v1986_v27 = vld [vmem:[#allocation2 + $0x18] sm:$0xff]  ;;  %2051 = vst [vmem:[#allocation2 + $0x50] sm:$0xff] %v3109_v33  ;;  %2052 = vst [vmem:[#allocation2 + $0x68] sm:$0xff] %v3109_v33  ;;  %s2101_s4 = sshll.u32 %s3110_s26, 4  ;;  %s2102_s4 = int_to_ptr.vmem [resolvable:$true] %s2101_s4 }
 0x4fe   : > { %2053 = vst [vmem:[#allocation2 + $0x8] sm:$0xff] %v3109_v33  ;;  %2054 = vst [vmem:[#allocation2 + $0x48] sm:$0xff] %v3109_v33  ;;  %s3017_s10 = scalar_lea.vmem %s2102_s4, 2048  ;;  %p3024_p3 = scmp.lt.s32.totalorder %s2102_s4, %s2102_s4 }
 0x4ff   : > { %2055 = vst [vmem:[#allocation2 + $0x40] sm:$0xff] %v3109_v33  ;;  %2056 = vst [vmem:[#allocation2 + $0x20] sm:$0xff] %v3109_v33  ;;  %p3018_p11 = scmp.ne.s32.totalorder %s2102_s4, %s3017_s10  ;;  %p3025_p2 = scmp.lt.s32.totalorder %s3017_s10, %s3017_s10 }
 0x500   : > { %2057 = vst [vmem:[#allocation2 + $0x10] sm:$0xff] %v3109_v33  ;;  %2058 = vst [vmem:[#allocation2 + $0x38] sm:$0xff] %v3109_v33 }
 0x501   : > { %2059 = vst [vmem:[#allocation2 + $0x60] sm:$0xff] %v3109_v33  ;;  %2060 = vst [vmem:[#allocation2 + $0x70] sm:$0xff] %v3109_v33  ;;  %p3019_p12 = pnand %p3018_p11, %p2370_p10  ;;  %p3026_p7 = por %p3025_p2, %p3024_p3 }
 0x502   : > { %2061 = vst [vmem:[#allocation2 + $0x78] sm:$0xff] %v3109_v33  ;;  %2062 = vst [vmem:[#allocation2 + $0x28] sm:$0xff] %v3109_v33 }
 0x503   : > { %2079 = vst [vmem:[#allocation16] sm:$0xff] %v1983_v24  ;;  %2080 = vst [vmem:[#allocation16 + $0x8] sm:$0xff] %v1984_v4  ;;  %p3020_p13 = pneg %p3019_p12 }
 0x504   : > { %2081 = vst [vmem:[#allocation16 + $0x10] sm:$0xff] %v1985_v17  ;;  %2083 = vst [vmem:[#allocation16 + $0x20] sm:$0xff] %v3109_v33 }
 0x505   : > { %2084 = vst [vmem:[#allocation16 + $0x28] sm:$0xff] %v3109_v33  ;;  %2085 = vst [vmem:[#allocation16 + $0x30] sm:$0xff] %v3109_v33  ;;  %p3027_p4 = pnand %p3026_p7, %p3020_p13 }
 0x506   : > { %2086 = vst [vmem:[#allocation16 + $0x38] sm:$0xff] %v3109_v33  ;;  %2087 = vst [vmem:[#allocation16 + $0x40] sm:$0xff] %v3109_v33 }
 0x507   : > { %2088 = vst [vmem:[#allocation16 + $0x48] sm:$0xff] %v3109_v33  ;;  %2089 = vst [vmem:[#allocation16 + $0x50] sm:$0xff] %v3109_v33 }
 0x508   : > { %2090 = vst [vmem:[#allocation16 + $0x58] sm:$0xff] %v3109_v33  ;;  %2091 = vst [vmem:[#allocation16 + $0x60] sm:$0xff] %v3109_v33 }
 0x509   : > { %2092 = vst [vmem:[#allocation16 + $0x68] sm:$0xff] %v3109_v33  ;;  %2093 = vst [vmem:[#allocation16 + $0x70] sm:$0xff] %v3109_v33 }
 0x50a   : > { %2094 = vst [vmem:[#allocation16 + $0x78] sm:$0xff] %v3109_v33  ;;  %2082 = vst [vmem:[#allocation16 + $0x18] sm:$0xff] %v1986_v27 }
 0x50b   : > { %3030 = shalt.err (!%p3027_p4)
}
 0x50c   : > { %s3111_s20 = smov 128   ;;  %s3112_s22 = smov 8  }
 0x50d   : > { %s3918_s30 = sld [smem:[#allocation38_spill]] }
 0x513   : > { %2680 = dma.vmem_to_hbm [thread:$0]  (%p2370_p10), %s2102_s4, 2048, %s3918_s30, [#allocation5], %s3111_s20, %s3111_s20, %s3112_s22  }
 0x514   : > { %3078 = dma.done.wait (%p2370_p10), [#allocation5], 2048  }
 0x515   : > { %3080 = vsyncadd (%p2370_p10), [#allocation5], 4294965248 }
 0x516 PF: > { %s3919_s20 = sld [smem:[#allocation23_spill]]  ;;  %s3921_s17 = smov %s3087_s18 }
 0x517   : > { %s3920_s29 = sld [smem:[#allocation24_spill]]  ;;  %s3922_s18 = smov %s3091_s19 }
 0x51c   : > { %p28_p1 = scmp.ge.s32.totalorder %s3919_s20, 5  }
 0x51d   : > { %s3923_s19 = smov %s3920_s29 }
 0x51e   :  { %30 = sbr.rel (!%p28_p1) target bundleno = 17 (0x11), region = 163 }
 0x523   :  { %2117 = vsyncpa [#allocation4], 1 }
 0x524   :  { %2119 = vsyncpa [#allocation4 + $0x1], 1 }
 0x525   :  { %2120 = vsyncpa [#allocation9], 1 }
 0x526   :  { %2121 = vsyncpa [#allocation12], 1 }
 0x527   :  { %2123 = vsyncpa [#allocation12 + $0x1], 1 }
 0x528   :  { %2124 = vsyncpa [#allocation15], 1 }
 0x529   :  { %2126 = vsyncpa [#allocation15 + $0x1], 1 }
 0x52a   :  { %2127 = vsyncpa [#allocation5], 1 }
 0x52b   :  { %2129 = vsyncpa [#allocation5 + $0x1], 1 }
 0x52c   :  { %2130 = vsyncpa [#allocation6], 1 }
 0x52d   :  { %2132 = vsyncpa [#allocation6 + $0x1], 1 }

</bundles_post_ra>
